<compile_context>
chip_gen: v5e
topology: v5e:2x2
jax: 0.10.0
libtpu: 0.0.40
codegen_flags: <defaults>
</compile_context>

<pallas_src>
import functools
import math

import jax
import jax.numpy as jnp
from jax import lax
from jax.experimental import pallas as pl
from jax.experimental.pallas import tpu as pltpu


def _cross_attention_kernel(
    x_ref,      # (Bb, Tq, dim)   activations (compute dtype)
    d_ref,      # (Bb, M,  dim)   distortion  (compute dtype)
    wq_ref,     # (dim, dim)  (in, out), scale pre-folded, compute dtype
    bq_ref,     # (1, dim)
    wk_ref,     # (dim, dim)
    bk_ref,     # (1, dim)
    wv_ref,     # (dim, dim)
    bv_ref,     # (1, dim)
    wo_ref,     # (dim, dim)
    bo_ref,     # (1, dim)
    o_ref,      # (Bb, Tq, dim)
    k_scratch,  # (Bb*M,  dim) compute dtype  -- persists across qi steps
    v_scratch,  # (Bb*M,  dim) compute dtype
    acc_scratch,  # (Bb*Tq, dim) f32          -- attention output slab
    *,
    num_heads: int,
    dim: int,
    batch_block: int,
    q_block: int,
    kv_len: int,
    flatten_q: bool,
    flatten_kv: bool,
):
    head_dim = dim // num_heads
    compute_dtype = x_ref.dtype

    # ---- K/V projections: once per batch block, cached across query tiles ----
    @pl.when(pl.program_id(1) == 0)
    def _():
        wk = wk_ref[...]
        wv = wv_ref[...]
        bk = bk_ref[0]
        bv = bv_ref[0]
        if flatten_kv:
            # One big lane-dense slab per projection (free view: kv_len % 8 == 0
            # or a single batch element).
            d2 = d_ref[...].reshape(batch_block * kv_len, dim)
            k2 = jnp.dot(d2, wk, preferred_element_type=jnp.float32) + bk
            v2 = jnp.dot(d2, wv, preferred_element_type=jnp.float32) + bv
            k_scratch[...] = k2.astype(compute_dtype)
            v_scratch[...] = v2.astype(compute_dtype)
        else:
            for b in range(batch_block):                      # static, unrolled
                d_b = d_ref[b]                                 # (M, dim)
                k_b = jnp.dot(d_b, wk, preferred_element_type=jnp.float32) + bk
                v_b = jnp.dot(d_b, wv, preferred_element_type=jnp.float32) + bv
                k_scratch[b * kv_len:(b + 1) * kv_len, :] = k_b.astype(compute_dtype)
                v_scratch[b * kv_len:(b + 1) * kv_len, :] = v_b.astype(compute_dtype)

    # ---- Q projection (scale already folded into wq/bq by the wrapper) ----
    wq = wq_ref[...]
    bq = bq_ref[0]
    if flatten_q:
        x2 = x_ref[...].reshape(batch_block * q_block, dim)
        q_all = (jnp.dot(x2, wq, preferred_element_type=jnp.float32)
                 + bq).astype(compute_dtype)

    # ---- per-(batch, head) attention; outputs stored straight into scratch ----
    for b in range(batch_block):                               # static, unrolled
        if flatten_q:
            q_b = q_all[b * q_block:(b + 1) * q_block]         # (Tq, dim)
        else:
            q_b = (jnp.dot(x_ref[b], wq, preferred_element_type=jnp.float32)
                   + bq).astype(compute_dtype)
        k_b = k_scratch[b * kv_len:(b + 1) * kv_len, :]        # (M, dim)
        v_b = v_scratch[b * kv_len:(b + 1) * kv_len, :]        # (M, dim)

        for h in range(num_heads):                             # static, unrolled
            lo = h * head_dim
            hi = lo + head_dim
            q_bh = q_b[:, lo:hi]                               # (Tq, hd)
            k_bh = k_b[:, lo:hi]                               # (M,  hd)
            v_bh = v_b[:, lo:hi]                               # (M,  hd)

            # scores: (Tq, M) = q_bh @ k_bh^T, f32 accumulation on the MXU.
            s = lax.dot_general(q_bh, k_bh, (((1,), (1,)), ((), ())),
                                preferred_element_type=jnp.float32)

            # Numerically-stable softmax (f32), normalization deferred to the
            # (Tq, hd) output instead of the (Tq, M) probability matrix.
            s_max = jnp.max(s, axis=-1, keepdims=True)
            p = jnp.exp(s - s_max)
            p_sum = jnp.sum(p, axis=-1, keepdims=True)

            o_bh = jnp.dot(p.astype(compute_dtype), v_bh,
                           preferred_element_type=jnp.float32)     # (Tq, hd)
            o_bh = o_bh * pl.reciprocal(p_sum, approx=True)         # EUP slot

            acc_scratch[b * q_block:(b + 1) * q_block, lo:hi] = o_bh

    # ---- output projection from the accumulated scratch slab ----
    wo = wo_ref[...]
    bo = bo_ref[0]
    a2 = acc_scratch[...].astype(compute_dtype)                    # (Bb*Tq, dim)
    out2 = jnp.dot(a2, wo, preferred_element_type=jnp.float32) + bo
    if flatten_q:
        o_ref[...] = out2.reshape(batch_block, q_block, dim).astype(o_ref.dtype)
    else:
        for b in range(batch_block):
            o_ref[b] = out2[b * q_block:(b + 1) * q_block].astype(o_ref.dtype)


# --------------------------- tiling heuristics -------------------------------

def _largest_divisor_leq(n, cap):
    cap = max(1, min(n, cap))
    for d in range(cap, 0, -1):
        if n % d == 0:
            return d
    return 1


def _pick_q_block(n, max_q=512):
    """Query-tile size: whole sequence if small, else the largest divisor of n
    that is <= max_q, preferring multiples of 256 (v6e/v7x MXU), then 128,
    then 8 (sublane constraint)."""
    if n <= max_q:
        return n
    for align in (256, 128, 8):
        for d in range(max_q, align - 1, -1):
            if n % d == 0 and d % align == 0:
                return d
    # No aligned divisor; fall back to the full sequence (caller shrinks
    # batch_block instead to control VMEM).
    return n


def _device_vmem_bytes():
    try:
        return int(pltpu.get_tpu_info().vmem_capacity_bytes)
    except Exception:
        return 64 * 1024 * 1024   # conservative: v7x per-TensorCore VMEM


def _step_vmem_estimate(bb, qb, kv, dim, act_bytes):
    """Rough per-grid-step VMEM footprint (double-buffered blocks + scratch +
    the dominant live intermediates)."""
    dbl = 2
    x_blk = dbl * bb * qb * dim * act_bytes
    o_blk = dbl * bb * qb * dim * act_bytes
    d_blk = dbl * bb * kv * dim * act_bytes
    weights = dbl * 4 * (dim * dim + dim) * act_bytes
    scratch = 2 * bb * kv * dim * act_bytes + bb * qb * dim * 4
    live = bb * qb * dim * (4 + act_bytes) + 2 * qb * kv * 4 + qb * dim * 4
    return x_blk + o_blk + d_blk + weights + scratch + live


# ------------------------------- wrapper --------------------------------------

def cross_attention(x, distortion, params, *, num_heads,
                    batch_block=None, q_block=None):
    """x: (B, N, dim), distortion: (B, M, dim). Returns (B, N, dim)."""
    B, N, dim = x.shape
    _, M, _ = distortion.shape
    assert dim % num_heads == 0, "dim must be divisible by num_heads"

    wq, bq, wk, bk, wv, bv, wo, bo = params
    compute_dtype = x.dtype
    act_bytes = jnp.dtype(compute_dtype).itemsize

    # Fold the reference's softmax scale 1/sqrt(dim) (intentionally NOT
    # 1/sqrt(head_dim) -- the PyTorch module divides by self.dim ** 0.5)
    # into the q projection once, host-side.
    scale = 1.0 / math.sqrt(dim)
    wq = wq.astype(jnp.float32) * scale
    bq = bq.astype(jnp.float32) * scale

    # Cast all weights/biases to the activation dtype so projection matmuls run
    # the matched-dtype MXU path (f32 accumulation happens inside the kernel).
    cast = lambda a: a.astype(compute_dtype)
    wq, bq, wk, bk, wv, bv, wo, bo = map(cast, (wq, bq, wk, bk, wv, bv, wo, bo))

    # --- VMEM-aware tile selection ---
    vmem_cap = _device_vmem_bytes()
    budget = max(8 << 20, int(vmem_cap * 0.45))

    auto_qb = q_block is None
    auto_bb = batch_block is None
    if auto_qb:
        q_block = _pick_q_block(N)
    if auto_bb:
        batch_block = _largest_divisor_leq(
            B, min(8, max(1, 1024 // max(q_block, 1))))

    est = lambda bb, qb: _step_vmem_estimate(bb, qb, M, dim, act_bytes)
    if auto_bb:
        while est(batch_block, q_block) > budget and batch_block > 1:
            batch_block = _largest_divisor_leq(B, batch_block - 1)
    if auto_qb:
        while est(batch_block, q_block) > budget:
            smaller = [d for d in range(8, q_block) if N % d == 0 and d % 8 == 0]
            if not smaller:
                break
            q_block = smaller[-1]

    assert N % q_block == 0, "q_block must divide N"
    assert B % batch_block == 0, "batch_block must divide B"

    # Flattened slabs only when reshapes cannot cross (8,128) tile boundaries.
    flatten_q = (batch_block == 1) or (q_block % 8 == 0)
    flatten_kv = (batch_block == 1) or (M % 8 == 0)

    vmem_limit = int(min(int(vmem_cap * 0.9),
                         max(32 << 20, 2 * est(batch_block, q_block))))

    grid = (B // batch_block, N // q_block)

    kernel = functools.partial(
        _cross_attention_kernel,
        num_heads=num_heads, dim=dim,
        batch_block=batch_block, q_block=q_block, kv_len=M,
        flatten_q=flatten_q, flatten_kv=flatten_kv)

    # Constant index_maps -> weights/biases DMA'd once and kept resident.
    w_spec = pl.BlockSpec((dim, dim), lambda b, qi: (0, 0))
    b_spec = pl.BlockSpec((1, dim), lambda b, qi: (0, 0))

    return pl.pallas_call(
        kernel,
        out_shape=jax.ShapeDtypeStruct((B, N, dim), x.dtype),
        grid_spec=pltpu.PrefetchScalarGridSpec(
            num_scalar_prefetch=0,
            grid=grid,
            in_specs=[
                pl.BlockSpec((batch_block, q_block, dim),
                             lambda b, qi: (b, qi, 0)),        # x
                pl.BlockSpec((batch_block, M, dim),
                             lambda b, qi: (b, 0, 0)),         # distortion
                w_spec, b_spec,                                # q proj
                w_spec, b_spec,                                # k proj
                w_spec, b_spec,                                # v proj
                w_spec, b_spec,                                # out proj
            ],
            out_specs=pl.BlockSpec((batch_block, q_block, dim),
                                   lambda b, qi: (b, qi, 0)),
            scratch_shapes=[
                pltpu.VMEM((batch_block * M, dim), compute_dtype),   # K cache
                pltpu.VMEM((batch_block * M, dim), compute_dtype),   # V cache
                pltpu.VMEM((batch_block * q_block, dim), jnp.float32),  # attn out
            ]),
        compiler_params=pltpu.CompilerParams(
            # Batch axis parallel (megacore); query-tile axis "arbitrary" so the
            # K/V scratch persists across the qi iterations of a batch block.
            dimension_semantics=("parallel", "arbitrary"),
            vmem_limit_bytes=vmem_limit),
    )(x, distortion, wq, bq, wk, bk, wv, bv, wo, bo)


# ------------------------------ params / ref -----------------------------------

def init_params(key, dim):
    """Deterministic parameters, shapes match nn.Linear(dim, dim) x4.
    Weights are stored pre-transposed as (in_dim, out_dim)."""
    ks = jax.random.split(key, 8)
    bound = 1.0 / math.sqrt(dim)
    mk_w = lambda k: jax.random.uniform(k, (dim, dim), jnp.float32, -bound, bound)
    mk_b = lambda k: jax.random.uniform(k, (1, dim), jnp.float32, -bound, bound)
    return (mk_w(ks[0]), mk_b(ks[1]),   # q
            mk_w(ks[2]), mk_b(ks[3]),   # k
            mk_w(ks[4]), mk_b(ks[5]),   # v
            mk_w(ks[6]), mk_b(ks[7]))   # out


def _reference(x, distortion, params, num_heads):
    """Pure-JAX reference mirroring the PyTorch forward."""
    wq, bq, wk, bk, wv, bv, wo, bo = params
    B, N, dim = x.shape
    _, M, _ = distortion.shape
    hd = dim // num_heads
    q = x @ wq + bq
    k = distortion @ wk + bk
    v = distortion @ wv + bv
    q = q.reshape(B, N, num_heads, hd).transpose(0, 2, 1, 3)
    k = k.reshape(B, M, num_heads, hd).transpose(0, 2, 1, 3)
    v = v.reshape(B, M, num_heads, hd).transpose(0, 2, 1, 3)
    scores = jnp.einsum('bhnd,bhmd->bhnm', q, k) / math.sqrt(dim)
    w = jax.nn.softmax(scores, axis=-1)
    o = jnp.einsum('bhnm,bhmd->bhnd', w, v)
    o = o.transpose(0, 2, 1, 3).reshape(B, N, dim)
    return o @ wo + bo


if __name__ == "__main__":
    key = jax.random.PRNGKey(0)
    kx, kd, kp = jax.random.split(key, 3)

    # Case 1: small shapes, single query tile per batch block.
    B, N, M, dim, num_heads = 2, 16, 8, 32, 4
    x = jax.random.normal(kx, (B, N, dim), jnp.float32)
    distortion = jax.random.normal(kd, (B, M, dim), jnp.float32)
    params = init_params(kp, dim)

    out = cross_attention(x, distortion, params, num_heads=num_heads)
    out = jax.block_until_ready(out)
    ref = _reference(x, distortion, params, num_heads)
    assert out.shape == (B, N, dim)
    # Tolerance is slightly loose because the softmax denominator uses the
    # hardware approximate reciprocal (EUP) instead of an exact divide.
    assert jnp.allclose(out, ref, atol=2e-3, rtol=2e-3), "mismatch vs reference (case 1)"

    # Case 2: multiple query tiles per batch block -> exercises the cached-K/V
    # path (pl.program_id(1) > 0 reuses the VMEM scratch).
    N2 = 32
    x2 = jax.random.normal(kx, (B, N2, dim), jnp.float32)
    out2 = cross_attention(x2, distortion, params, num_heads=num_heads, q_block=16)
    out2 = jax.block_until_ready(out2)
    ref2 = _reference(x2, distortion, params, num_heads)
    assert out2.shape == (B, N2, dim)
    assert jnp.allclose(out2, ref2, atol=2e-3, rtol=2e-3), "mismatch vs reference (case 2)"

    print("KERNEL_OK")
</pallas_src>

<mosaic_0001>
module attributes {stable_mosaic.version = 11 : i64} {
  func.func @_cross_attention_kernel(%arg0: i32, %arg1: i32, %arg2: memref<2x16x32xf32, #tpu.memory_space<vmem>>, %arg3: memref<2x8x32xf32, #tpu.memory_space<vmem>>, %arg4: memref<32x32xf32, #tpu.memory_space<vmem>>, %arg5: memref<1x32xf32, #tpu.memory_space<vmem>>, %arg6: memref<32x32xf32, #tpu.memory_space<vmem>>, %arg7: memref<1x32xf32, #tpu.memory_space<vmem>>, %arg8: memref<32x32xf32, #tpu.memory_space<vmem>>, %arg9: memref<1x32xf32, #tpu.memory_space<vmem>>, %arg10: memref<32x32xf32, #tpu.memory_space<vmem>>, %arg11: memref<1x32xf32, #tpu.memory_space<vmem>>, %arg12: memref<2x16x32xf32, #tpu.memory_space<vmem>>, %arg13: memref<16x32xf32, #tpu.memory_space<vmem>>, %arg14: memref<16x32xf32, #tpu.memory_space<vmem>>, %arg15: memref<32x32xf32, #tpu.memory_space<vmem>>) attributes {dimension_semantics = [#tpu.dimension_semantics<parallel>, #tpu.dimension_semantics<arbitrary>], iteration_bounds = array<i64: 1, 1>, scalar_prefetch = 0 : i64, scratch_operands = 3 : i64, tpu.core_type = #tpu.core_type<tc>, window_params = [{transform_indices = @transform_0, window_bounds = array<i64: 2, 16, 32>}, {transform_indices = @transform_1, window_bounds = array<i64: 2, 8, 32>}, {pipeline_mode = #tpu.pipeline_mode<synchronous>, transform_indices = @transform_2, window_bounds = array<i64: 32, 32>}, {pipeline_mode = #tpu.pipeline_mode<synchronous>, transform_indices = @transform_3, window_bounds = array<i64: 1, 32>}, {pipeline_mode = #tpu.pipeline_mode<synchronous>, transform_indices = @transform_4, window_bounds = array<i64: 32, 32>}, {pipeline_mode = #tpu.pipeline_mode<synchronous>, transform_indices = @transform_5, window_bounds = array<i64: 1, 32>}, {pipeline_mode = #tpu.pipeline_mode<synchronous>, transform_indices = @transform_6, window_bounds = array<i64: 32, 32>}, {pipeline_mode = #tpu.pipeline_mode<synchronous>, transform_indices = @transform_7, window_bounds = array<i64: 1, 32>}, {pipeline_mode = #tpu.pipeline_mode<synchronous>, transform_indices = @transform_8, window_bounds = array<i64: 32, 32>}, {pipeline_mode = #tpu.pipeline_mode<synchronous>, transform_indices = @transform_9, window_bounds = array<i64: 1, 32>}, {transform_indices = @transform_10, window_bounds = array<i64: 2, 16, 32>}]} {
    %c0_i32 = arith.constant 0 : i32
    %0 = arith.cmpi eq, %arg1, %c0_i32 : i32
    %1 = arith.extui %0 : i1 to i32
    %c0_i32_0 = arith.constant 0 : i32
    %2 = arith.cmpi ne, %1, %c0_i32_0 : i32
    scf.if %2 {
      %c0_70 = arith.constant 0 : index
      %c0_71 = arith.constant 0 : index
      %156 = vector.load %arg6[%c0_70, %c0_71] : memref<32x32xf32, #tpu.memory_space<vmem>>, vector<32x32xf32>
      %c0_72 = arith.constant 0 : index
      %c0_73 = arith.constant 0 : index
      %157 = vector.load %arg8[%c0_72, %c0_73] : memref<32x32xf32, #tpu.memory_space<vmem>>, vector<32x32xf32>
      %c0_74 = arith.constant 0 : index
      %c0_75 = arith.constant 0 : index
      %158 = vector.load %arg7[%c0_74, %c0_75] : memref<1x32xf32, #tpu.memory_space<vmem>>, vector<1x32xf32>
      %159 = vector.shape_cast %158 : vector<1x32xf32> to vector<32xf32>
      %c0_76 = arith.constant 0 : index
      %c0_77 = arith.constant 0 : index
      %160 = vector.load %arg9[%c0_76, %c0_77] : memref<1x32xf32, #tpu.memory_space<vmem>>, vector<1x32xf32>
      %161 = vector.shape_cast %160 : vector<1x32xf32> to vector<32xf32>
      %c0_78 = arith.constant 0 : index
      %c0_79 = arith.constant 0 : index
      %c0_80 = arith.constant 0 : index
      %162 = vector.load %arg3[%c0_78, %c0_79, %c0_80] : memref<2x8x32xf32, #tpu.memory_space<vmem>>, vector<2x8x32xf32>
      %163 = vector.shape_cast %162 : vector<2x8x32xf32> to vector<16x32xf32>
      %cst_81 = arith.constant dense<0.000000e+00> : vector<16x32xf32>
      %164 = tpu.matmul %163, %156, %cst_81 {dimension_numbers = #tpu.dot_dimension_numbers<[1], [0], [0], [1], [0, 0, 1, 1], [], []>} : vector<16x32xf32>, vector<32x32xf32>, vector<16x32xf32> -> vector<16x32xf32>
      %165 = vector.shape_cast %159 : vector<32xf32> to vector<1x32xf32>
      %166 = vector.broadcast %165 : vector<1x32xf32> to vector<16x32xf32>
      %167 = arith.addf %164, %166 : vector<16x32xf32>
      %cst_82 = arith.constant dense<0.000000e+00> : vector<16x32xf32>
      %168 = tpu.matmul %163, %157, %cst_82 {dimension_numbers = #tpu.dot_dimension_numbers<[1], [0], [0], [1], [0, 0, 1, 1], [], []>} : vector<16x32xf32>, vector<32x32xf32>, vector<16x32xf32> -> vector<16x32xf32>
      %169 = vector.shape_cast %161 : vector<32xf32> to vector<1x32xf32>
      %170 = vector.broadcast %169 : vector<1x32xf32> to vector<16x32xf32>
      %171 = arith.addf %168, %170 : vector<16x32xf32>
      %c0_83 = arith.constant 0 : index
      %c0_84 = arith.constant 0 : index
      %172 = vector.load %arg13[%c0_83, %c0_84] : memref<16x32xf32, #tpu.memory_space<vmem>>, vector<16x32xf32>
      tpu.vector_store %arg13[%c0_83, %c0_84], %167 {strides = array<i32>} : memref<16x32xf32, #tpu.memory_space<vmem>>, vector<16x32xf32>,
      %c0_85 = arith.constant 0 : index
      %c0_86 = arith.constant 0 : index
      %173 = vector.load %arg14[%c0_85, %c0_86] : memref<16x32xf32, #tpu.memory_space<vmem>>, vector<16x32xf32>
      tpu.vector_store %arg14[%c0_85, %c0_86], %171 {strides = array<i32>} : memref<16x32xf32, #tpu.memory_space<vmem>>, vector<16x32xf32>,
    } else {
    }
    %c0 = arith.constant 0 : index
    %c0_1 = arith.constant 0 : index
    %3 = vector.load %arg4[%c0, %c0_1] : memref<32x32xf32, #tpu.memory_space<vmem>>, vector<32x32xf32>
    %c0_2 = arith.constant 0 : index
    %c0_3 = arith.constant 0 : index
    %4 = vector.load %arg5[%c0_2, %c0_3] : memref<1x32xf32, #tpu.memory_space<vmem>>, vector<1x32xf32>
    %5 = vector.shape_cast %4 : vector<1x32xf32> to vector<32xf32>
    %c0_4 = arith.constant 0 : index
    %c0_5 = arith.constant 0 : index
    %c0_6 = arith.constant 0 : index
    %6 = vector.load %arg2[%c0_4, %c0_5, %c0_6] : memref<2x16x32xf32, #tpu.memory_space<vmem>>, vector<2x16x32xf32>
    %7 = vector.shape_cast %6 : vector<2x16x32xf32> to vector<32x32xf32>
    %cst = arith.constant dense<0.000000e+00> : vector<32x32xf32>
    %8 = tpu.matmul %7, %3, %cst {dimension_numbers = #tpu.dot_dimension_numbers<[1], [0], [0], [1], [0, 0, 1, 1], [], []>} : vector<32x32xf32>, vector<32x32xf32>, vector<32x32xf32> -> vector<32x32xf32>
    %9 = vector.shape_cast %5 : vector<32xf32> to vector<1x32xf32>
    %10 = vector.broadcast %9 : vector<1x32xf32> to vector<32x32xf32>
    %11 = arith.addf %8, %10 : vector<32x32xf32>
    %12 = vector.extract_strided_slice %11 {offsets = [0, 0], sizes = [16, 32], strides = [1, 1]} : vector<32x32xf32> to vector<16x32xf32>
    %c0_7 = arith.constant 0 : index
    %c0_8 = arith.constant 0 : index
    %13 = vector.load %arg13[%c0_7, %c0_8] : memref<16x32xf32, #tpu.memory_space<vmem>>, vector<8x32xf32>
    %c0_9 = arith.constant 0 : index
    %c0_10 = arith.constant 0 : index
    %14 = vector.load %arg14[%c0_9, %c0_10] : memref<16x32xf32, #tpu.memory_space<vmem>>, vector<8x32xf32>
    %15 = vector.extract_strided_slice %12 {offsets = [0, 0], sizes = [16, 8], strides = [1, 1]} : vector<16x32xf32> to vector<16x8xf32>
    %16 = vector.extract_strided_slice %13 {offsets = [0, 0], sizes = [8, 8], strides = [1, 1]} : vector<8x32xf32> to vector<8x8xf32>
    %17 = vector.extract_strided_slice %14 {offsets = [0, 0], sizes = [8, 8], strides = [1, 1]} : vector<8x32xf32> to vector<8x8xf32>
    %cst_11 = arith.constant dense<0.000000e+00> : vector<16x8xf32>
    %18 = tpu.matmul %15, %16, %cst_11 {dimension_numbers = #tpu.dot_dimension_numbers<[1], [1], [0], [0], [0, 0, 1, 0], [], []>} : vector<16x8xf32>, vector<8x8xf32>, vector<16x8xf32> -> vector<16x8xf32>
    %cst_12 = arith.constant dense<0xFF800000> : vector<16xf32>
    %19 = vector.multi_reduction <maximumf>, %18, %cst_12 [1] : vector<16x8xf32> to vector<16xf32>
    %20 = vector.shape_cast %19 : vector<16xf32> to vector<16x1xf32>
    %21 = vector.broadcast %20 : vector<16x1xf32> to vector<16x8xf32>
    %22 = arith.subf %18, %21 : vector<16x8xf32>
    %23 = math.exp %22 : vector<16x8xf32>
    %cst_13 = arith.constant dense<0.000000e+00> : vector<16xf32>
    %24 = vector.multi_reduction <add>, %23, %cst_13 [1] : vector<16x8xf32> to vector<16xf32>
    %25 = vector.shape_cast %24 : vector<16xf32> to vector<16x1xf32>
    %cst_14 = arith.constant dense<0.000000e+00> : vector<16x8xf32>
    %26 = tpu.matmul %23, %17, %cst_14 {dimension_numbers = #tpu.dot_dimension_numbers<[1], [0], [0], [1], [0, 0, 1, 1], [], []>} : vector<16x8xf32>, vector<8x8xf32>, vector<16x8xf32> -> vector<16x8xf32>
    %27 = tpu.reciprocal %25 {approx = true} : vector<16x1xf32> -> vector<16x1xf32>
    %28 = vector.broadcast %27 : vector<16x1xf32> to vector<16x8xf32>
    %29 = arith.mulf %26, %28 : vector<16x8xf32>
    %c0_15 = arith.constant 0 : index
    %c0_16 = arith.constant 0 : index
    %30 = vector.load %arg15[%c0_15, %c0_16] : memref<32x32xf32, #tpu.memory_space<vmem>>, vector<16x8xf32>
    tpu.vector_store %arg15[%c0_15, %c0_16], %29 {strides = array<i32>} : memref<32x32xf32, #tpu.memory_space<vmem>>, vector<16x8xf32>,
    %31 = vector.extract_strided_slice %12 {offsets = [0, 8], sizes = [16, 8], strides = [1, 1]} : vector<16x32xf32> to vector<16x8xf32>
    %32 = vector.extract_strided_slice %13 {offsets = [0, 8], sizes = [8, 8], strides = [1, 1]} : vector<8x32xf32> to vector<8x8xf32>
    %33 = vector.extract_strided_slice %14 {offsets = [0, 8], sizes = [8, 8], strides = [1, 1]} : vector<8x32xf32> to vector<8x8xf32>
    %cst_17 = arith.constant dense<0.000000e+00> : vector<16x8xf32>
    %34 = tpu.matmul %31, %32, %cst_17 {dimension_numbers = #tpu.dot_dimension_numbers<[1], [1], [0], [0], [0, 0, 1, 0], [], []>} : vector<16x8xf32>, vector<8x8xf32>, vector<16x8xf32> -> vector<16x8xf32>
    %cst_18 = arith.constant dense<0xFF800000> : vector<16xf32>
    %35 = vector.multi_reduction <maximumf>, %34, %cst_18 [1] : vector<16x8xf32> to vector<16xf32>
    %36 = vector.shape_cast %35 : vector<16xf32> to vector<16x1xf32>
    %37 = vector.broadcast %36 : vector<16x1xf32> to vector<16x8xf32>
    %38 = arith.subf %34, %37 : vector<16x8xf32>
    %39 = math.exp %38 : vector<16x8xf32>
    %cst_19 = arith.constant dense<0.000000e+00> : vector<16xf32>
    %40 = vector.multi_reduction <add>, %39, %cst_19 [1] : vector<16x8xf32> to vector<16xf32>
    %41 = vector.shape_cast %40 : vector<16xf32> to vector<16x1xf32>
    %cst_20 = arith.constant dense<0.000000e+00> : vector<16x8xf32>
    %42 = tpu.matmul %39, %33, %cst_20 {dimension_numbers = #tpu.dot_dimension_numbers<[1], [0], [0], [1], [0, 0, 1, 1], [], []>} : vector<16x8xf32>, vector<8x8xf32>, vector<16x8xf32> -> vector<16x8xf32>
    %43 = tpu.reciprocal %41 {approx = true} : vector<16x1xf32> -> vector<16x1xf32>
    %44 = vector.broadcast %43 : vector<16x1xf32> to vector<16x8xf32>
    %45 = arith.mulf %42, %44 : vector<16x8xf32>
    %c0_21 = arith.constant 0 : index
    %c8 = arith.constant 8 : index
    %46 = vector.load %arg15[%c0_21, %c8] : memref<32x32xf32, #tpu.memory_space<vmem>>, vector<16x8xf32>
    tpu.vector_store %arg15[%c0_21, %c8], %45 {strides = array<i32>} : memref<32x32xf32, #tpu.memory_space<vmem>>, vector<16x8xf32>,
    %47 = vector.extract_strided_slice %12 {offsets = [0, 16], sizes = [16, 8], strides = [1, 1]} : vector<16x32xf32> to vector<16x8xf32>
    %48 = vector.extract_strided_slice %13 {offsets = [0, 16], sizes = [8, 8], strides = [1, 1]} : vector<8x32xf32> to vector<8x8xf32>
    %49 = vector.extract_strided_slice %14 {offsets = [0, 16], sizes = [8, 8], strides = [1, 1]} : vector<8x32xf32> to vector<8x8xf32>
    %cst_22 = arith.constant dense<0.000000e+00> : vector<16x8xf32>
    %50 = tpu.matmul %47, %48, %cst_22 {dimension_numbers = #tpu.dot_dimension_numbers<[1], [1], [0], [0], [0, 0, 1, 0], [], []>} : vector<16x8xf32>, vector<8x8xf32>, vector<16x8xf32> -> vector<16x8xf32>
    %cst_23 = arith.constant dense<0xFF800000> : vector<16xf32>
    %51 = vector.multi_reduction <maximumf>, %50, %cst_23 [1] : vector<16x8xf32> to vector<16xf32>
    %52 = vector.shape_cast %51 : vector<16xf32> to vector<16x1xf32>
    %53 = vector.broadcast %52 : vector<16x1xf32> to vector<16x8xf32>
    %54 = arith.subf %50, %53 : vector<16x8xf32>
    %55 = math.exp %54 : vector<16x8xf32>
    %cst_24 = arith.constant dense<0.000000e+00> : vector<16xf32>
    %56 = vector.multi_reduction <add>, %55, %cst_24 [1] : vector<16x8xf32> to vector<16xf32>
    %57 = vector.shape_cast %56 : vector<16xf32> to vector<16x1xf32>
    %cst_25 = arith.constant dense<0.000000e+00> : vector<16x8xf32>
    %58 = tpu.matmul %55, %49, %cst_25 {dimension_numbers = #tpu.dot_dimension_numbers<[1], [0], [0], [1], [0, 0, 1, 1], [], []>} : vector<16x8xf32>, vector<8x8xf32>, vector<16x8xf32> -> vector<16x8xf32>
    %59 = tpu.reciprocal %57 {approx = true} : vector<16x1xf32> -> vector<16x1xf32>
    %60 = vector.broadcast %59 : vector<16x1xf32> to vector<16x8xf32>
    %61 = arith.mulf %58, %60 : vector<16x8xf32>
    %c0_26 = arith.constant 0 : index
    %c16 = arith.constant 16 : index
    %62 = vector.load %arg15[%c0_26, %c16] : memref<32x32xf32, #tpu.memory_space<vmem>>, vector<16x8xf32>
    tpu.vector_store %arg15[%c0_26, %c16], %61 {strides = array<i32>} : memref<32x32xf32, #tpu.memory_space<vmem>>, vector<16x8xf32>,
    %63 = vector.extract_strided_slice %12 {offsets = [0, 24], sizes = [16, 8], strides = [1, 1]} : vector<16x32xf32> to vector<16x8xf32>
    %64 = vector.extract_strided_slice %13 {offsets = [0, 24], sizes = [8, 8], strides = [1, 1]} : vector<8x32xf32> to vector<8x8xf32>
    %65 = vector.extract_strided_slice %14 {offsets = [0, 24], sizes = [8, 8], strides = [1, 1]} : vector<8x32xf32> to vector<8x8xf32>
    %cst_27 = arith.constant dense<0.000000e+00> : vector<16x8xf32>
    %66 = tpu.matmul %63, %64, %cst_27 {dimension_numbers = #tpu.dot_dimension_numbers<[1], [1], [0], [0], [0, 0, 1, 0], [], []>} : vector<16x8xf32>, vector<8x8xf32>, vector<16x8xf32> -> vector<16x8xf32>
    %cst_28 = arith.constant dense<0xFF800000> : vector<16xf32>
    %67 = vector.multi_reduction <maximumf>, %66, %cst_28 [1] : vector<16x8xf32> to vector<16xf32>
    %68 = vector.shape_cast %67 : vector<16xf32> to vector<16x1xf32>
    %69 = vector.broadcast %68 : vector<16x1xf32> to vector<16x8xf32>
    %70 = arith.subf %66, %69 : vector<16x8xf32>
    %71 = math.exp %70 : vector<16x8xf32>
    %cst_29 = arith.constant dense<0.000000e+00> : vector<16xf32>
    %72 = vector.multi_reduction <add>, %71, %cst_29 [1] : vector<16x8xf32> to vector<16xf32>
    %73 = vector.shape_cast %72 : vector<16xf32> to vector<16x1xf32>
    %cst_30 = arith.constant dense<0.000000e+00> : vector<16x8xf32>
    %74 = tpu.matmul %71, %65, %cst_30 {dimension_numbers = #tpu.dot_dimension_numbers<[1], [0], [0], [1], [0, 0, 1, 1], [], []>} : vector<16x8xf32>, vector<8x8xf32>, vector<16x8xf32> -> vector<16x8xf32>
    %75 = tpu.reciprocal %73 {approx = true} : vector<16x1xf32> -> vector<16x1xf32>
    %76 = vector.broadcast %75 : vector<16x1xf32> to vector<16x8xf32>
    %77 = arith.mulf %74, %76 : vector<16x8xf32>
    %c0_31 = arith.constant 0 : index
    %c24 = arith.constant 24 : index
    %78 = vector.load %arg15[%c0_31, %c24] : memref<32x32xf32, #tpu.memory_space<vmem>>, vector<16x8xf32>
    tpu.vector_store %arg15[%c0_31, %c24], %77 {strides = array<i32>} : memref<32x32xf32, #tpu.memory_space<vmem>>, vector<16x8xf32>,
    %79 = vector.extract_strided_slice %11 {offsets = [16, 0], sizes = [16, 32], strides = [1, 1]} : vector<32x32xf32> to vector<16x32xf32>
    %c8_32 = arith.constant 8 : index
    %c0_33 = arith.constant 0 : index
    %80 = vector.load %arg13[%c8_32, %c0_33] : memref<16x32xf32, #tpu.memory_space<vmem>>, vector<8x32xf32>
    %c8_34 = arith.constant 8 : index
    %c0_35 = arith.constant 0 : index
    %81 = vector.load %arg14[%c8_34, %c0_35] : memref<16x32xf32, #tpu.memory_space<vmem>>, vector<8x32xf32>
    %82 = vector.extract_strided_slice %79 {offsets = [0, 0], sizes = [16, 8], strides = [1, 1]} : vector<16x32xf32> to vector<16x8xf32>
    %83 = vector.extract_strided_slice %80 {offsets = [0, 0], sizes = [8, 8], strides = [1, 1]} : vector<8x32xf32> to vector<8x8xf32>
    %84 = vector.extract_strided_slice %81 {offsets = [0, 0], sizes = [8, 8], strides = [1, 1]} : vector<8x32xf32> to vector<8x8xf32>
    %cst_36 = arith.constant dense<0.000000e+00> : vector<16x8xf32>
    %85 = tpu.matmul %82, %83, %cst_36 {dimension_numbers = #tpu.dot_dimension_numbers<[1], [1], [0], [0], [0, 0, 1, 0], [], []>} : vector<16x8xf32>, vector<8x8xf32>, vector<16x8xf32> -> vector<16x8xf32>
    %cst_37 = arith.constant dense<0xFF800000> : vector<16xf32>
    %86 = vector.multi_reduction <maximumf>, %85, %cst_37 [1] : vector<16x8xf32> to vector<16xf32>
    %87 = vector.shape_cast %86 : vector<16xf32> to vector<16x1xf32>
    %88 = vector.broadcast %87 : vector<16x1xf32> to vector<16x8xf32>
    %89 = arith.subf %85, %88 : vector<16x8xf32>
    %90 = math.exp %89 : vector<16x8xf32>
    %cst_38 = arith.constant dense<0.000000e+00> : vector<16xf32>
    %91 = vector.multi_reduction <add>, %90, %cst_38 [1] : vector<16x8xf32> to vector<16xf32>
    %92 = vector.shape_cast %91 : vector<16xf32> to vector<16x1xf32>
    %cst_39 = arith.constant dense<0.000000e+00> : vector<16x8xf32>
    %93 = tpu.matmul %90, %84, %cst_39 {dimension_numbers = #tpu.dot_dimension_numbers<[1], [0], [0], [1], [0, 0, 1, 1], [], []>} : vector<16x8xf32>, vector<8x8xf32>, vector<16x8xf32> -> vector<16x8xf32>
    %94 = tpu.reciprocal %92 {approx = true} : vector<16x1xf32> -> vector<16x1xf32>
    %95 = vector.broadcast %94 : vector<16x1xf32> to vector<16x8xf32>
    %96 = arith.mulf %93, %95 : vector<16x8xf32>
    %c16_40 = arith.constant 16 : index
    %c0_41 = arith.constant 0 : index
    %97 = vector.load %arg15[%c16_40, %c0_41] : memref<32x32xf32, #tpu.memory_space<vmem>>, vector<16x8xf32>
    tpu.vector_store %arg15[%c16_40, %c0_41], %96 {strides = array<i32>} : memref<32x32xf32, #tpu.memory_space<vmem>>, vector<16x8xf32>,
    %98 = vector.extract_strided_slice %79 {offsets = [0, 8], sizes = [16, 8], strides = [1, 1]} : vector<16x32xf32> to vector<16x8xf32>
    %99 = vector.extract_strided_slice %80 {offsets = [0, 8], sizes = [8, 8], strides = [1, 1]} : vector<8x32xf32> to vector<8x8xf32>
    %100 = vector.extract_strided_slice %81 {offsets = [0, 8], sizes = [8, 8], strides = [1, 1]} : vector<8x32xf32> to vector<8x8xf32>
    %cst_42 = arith.constant dense<0.000000e+00> : vector<16x8xf32>
    %101 = tpu.matmul %98, %99, %cst_42 {dimension_numbers = #tpu.dot_dimension_numbers<[1], [1], [0], [0], [0, 0, 1, 0], [], []>} : vector<16x8xf32>, vector<8x8xf32>, vector<16x8xf32> -> vector<16x8xf32>
    %cst_43 = arith.constant dense<0xFF800000> : vector<16xf32>
    %102 = vector.multi_reduction <maximumf>, %101, %cst_43 [1] : vector<16x8xf32> to vector<16xf32>
    %103 = vector.shape_cast %102 : vector<16xf32> to vector<16x1xf32>
    %104 = vector.broadcast %103 : vector<16x1xf32> to vector<16x8xf32>
    %105 = arith.subf %101, %104 : vector<16x8xf32>
    %106 = math.exp %105 : vector<16x8xf32>
    %cst_44 = arith.constant dense<0.000000e+00> : vector<16xf32>
    %107 = vector.multi_reduction <add>, %106, %cst_44 [1] : vector<16x8xf32> to vector<16xf32>
    %108 = vector.shape_cast %107 : vector<16xf32> to vector<16x1xf32>
    %cst_45 = arith.constant dense<0.000000e+00> : vector<16x8xf32>
    %109 = tpu.matmul %106, %100, %cst_45 {dimension_numbers = #tpu.dot_dimension_numbers<[1], [0], [0], [1], [0, 0, 1, 1], [], []>} : vector<16x8xf32>, vector<8x8xf32>, vector<16x8xf32> -> vector<16x8xf32>
    %110 = tpu.reciprocal %108 {approx = true} : vector<16x1xf32> -> vector<16x1xf32>
    %111 = vector.broadcast %110 : vector<16x1xf32> to vector<16x8xf32>
    %112 = arith.mulf %109, %111 : vector<16x8xf32>
    %c16_46 = arith.constant 16 : index
    %c8_47 = arith.constant 8 : index
    %113 = vector.load %arg15[%c16_46, %c8_47] : memref<32x32xf32, #tpu.memory_space<vmem>>, vector<16x8xf32>
    tpu.vector_store %arg15[%c16_46, %c8_47], %112 {strides = array<i32>} : memref<32x32xf32, #tpu.memory_space<vmem>>, vector<16x8xf32>,
    %114 = vector.extract_strided_slice %79 {offsets = [0, 16], sizes = [16, 8], strides = [1, 1]} : vector<16x32xf32> to vector<16x8xf32>
    %115 = vector.extract_strided_slice %80 {offsets = [0, 16], sizes = [8, 8], strides = [1, 1]} : vector<8x32xf32> to vector<8x8xf32>
    %116 = vector.extract_strided_slice %81 {offsets = [0, 16], sizes = [8, 8], strides = [1, 1]} : vector<8x32xf32> to vector<8x8xf32>
    %cst_48 = arith.constant dense<0.000000e+00> : vector<16x8xf32>
    %117 = tpu.matmul %114, %115, %cst_48 {dimension_numbers = #tpu.dot_dimension_numbers<[1], [1], [0], [0], [0, 0, 1, 0], [], []>} : vector<16x8xf32>, vector<8x8xf32>, vector<16x8xf32> -> vector<16x8xf32>
    %cst_49 = arith.constant dense<0xFF800000> : vector<16xf32>
    %118 = vector.multi_reduction <maximumf>, %117, %cst_49 [1] : vector<16x8xf32> to vector<16xf32>
    %119 = vector.shape_cast %118 : vector<16xf32> to vector<16x1xf32>
    %120 = vector.broadcast %119 : vector<16x1xf32> to vector<16x8xf32>
    %121 = arith.subf %117, %120 : vector<16x8xf32>
    %122 = math.exp %121 : vector<16x8xf32>
    %cst_50 = arith.constant dense<0.000000e+00> : vector<16xf32>
    %123 = vector.multi_reduction <add>, %122, %cst_50 [1] : vector<16x8xf32> to vector<16xf32>
    %124 = vector.shape_cast %123 : vector<16xf32> to vector<16x1xf32>
    %cst_51 = arith.constant dense<0.000000e+00> : vector<16x8xf32>
    %125 = tpu.matmul %122, %116, %cst_51 {dimension_numbers = #tpu.dot_dimension_numbers<[1], [0], [0], [1], [0, 0, 1, 1], [], []>} : vector<16x8xf32>, vector<8x8xf32>, vector<16x8xf32> -> vector<16x8xf32>
    %126 = tpu.reciprocal %124 {approx = true} : vector<16x1xf32> -> vector<16x1xf32>
    %127 = vector.broadcast %126 : vector<16x1xf32> to vector<16x8xf32>
    %128 = arith.mulf %125, %127 : vector<16x8xf32>
    %c16_52 = arith.constant 16 : index
    %c16_53 = arith.constant 16 : index
    %129 = vector.load %arg15[%c16_52, %c16_53] : memref<32x32xf32, #tpu.memory_space<vmem>>, vector<16x8xf32>
    tpu.vector_store %arg15[%c16_52, %c16_53], %128 {strides = array<i32>} : memref<32x32xf32, #tpu.memory_space<vmem>>, vector<16x8xf32>,
    %130 = vector.extract_strided_slice %79 {offsets = [0, 24], sizes = [16, 8], strides = [1, 1]} : vector<16x32xf32> to vector<16x8xf32>
    %131 = vector.extract_strided_slice %80 {offsets = [0, 24], sizes = [8, 8], strides = [1, 1]} : vector<8x32xf32> to vector<8x8xf32>
    %132 = vector.extract_strided_slice %81 {offsets = [0, 24], sizes = [8, 8], strides = [1, 1]} : vector<8x32xf32> to vector<8x8xf32>
    %cst_54 = arith.constant dense<0.000000e+00> : vector<16x8xf32>
    %133 = tpu.matmul %130, %131, %cst_54 {dimension_numbers = #tpu.dot_dimension_numbers<[1], [1], [0], [0], [0, 0, 1, 0], [], []>} : vector<16x8xf32>, vector<8x8xf32>, vector<16x8xf32> -> vector<16x8xf32>
    %cst_55 = arith.constant dense<0xFF800000> : vector<16xf32>
    %134 = vector.multi_reduction <maximumf>, %133, %cst_55 [1] : vector<16x8xf32> to vector<16xf32>
    %135 = vector.shape_cast %134 : vector<16xf32> to vector<16x1xf32>
    %136 = vector.broadcast %135 : vector<16x1xf32> to vector<16x8xf32>
    %137 = arith.subf %133, %136 : vector<16x8xf32>
    %138 = math.exp %137 : vector<16x8xf32>
    %cst_56 = arith.constant dense<0.000000e+00> : vector<16xf32>
    %139 = vector.multi_reduction <add>, %138, %cst_56 [1] : vector<16x8xf32> to vector<16xf32>
    %140 = vector.shape_cast %139 : vector<16xf32> to vector<16x1xf32>
    %cst_57 = arith.constant dense<0.000000e+00> : vector<16x8xf32>
    %141 = tpu.matmul %138, %132, %cst_57 {dimension_numbers = #tpu.dot_dimension_numbers<[1], [0], [0], [1], [0, 0, 1, 1], [], []>} : vector<16x8xf32>, vector<8x8xf32>, vector<16x8xf32> -> vector<16x8xf32>
    %142 = tpu.reciprocal %140 {approx = true} : vector<16x1xf32> -> vector<16x1xf32>
    %143 = vector.broadcast %142 : vector<16x1xf32> to vector<16x8xf32>
    %144 = arith.mulf %141, %143 : vector<16x8xf32>
    %c16_58 = arith.constant 16 : index
    %c24_59 = arith.constant 24 : index
    %145 = vector.load %arg15[%c16_58, %c24_59] : memref<32x32xf32, #tpu.memory_space<vmem>>, vector<16x8xf32>
    tpu.vector_store %arg15[%c16_58, %c24_59], %144 {strides = array<i32>} : memref<32x32xf32, #tpu.memory_space<vmem>>, vector<16x8xf32>,
    %c0_60 = arith.constant 0 : index
    %c0_61 = arith.constant 0 : index
    %146 = vector.load %arg10[%c0_60, %c0_61] : memref<32x32xf32, #tpu.memory_space<vmem>>, vector<32x32xf32>
    %c0_62 = arith.constant 0 : index
    %c0_63 = arith.constant 0 : index
    %147 = vector.load %arg11[%c0_62, %c0_63] : memref<1x32xf32, #tpu.memory_space<vmem>>, vector<1x32xf32>
    %148 = vector.shape_cast %147 : vector<1x32xf32> to vector<32xf32>
    %c0_64 = arith.constant 0 : index
    %c0_65 = arith.constant 0 : index
    %149 = vector.load %arg15[%c0_64, %c0_65] : memref<32x32xf32, #tpu.memory_space<vmem>>, vector<32x32xf32>
    %cst_66 = arith.constant dense<0.000000e+00> : vector<32x32xf32>
    %150 = tpu.matmul %149, %146, %cst_66 {dimension_numbers = #tpu.dot_dimension_numbers<[1], [0], [0], [1], [0, 0, 1, 1], [], []>} : vector<32x32xf32>, vector<32x32xf32>, vector<32x32xf32> -> vector<32x32xf32>
    %151 = vector.shape_cast %148 : vector<32xf32> to vector<1x32xf32>
    %152 = vector.broadcast %151 : vector<1x32xf32> to vector<32x32xf32>
    %153 = arith.addf %150, %152 : vector<32x32xf32>
    %154 = vector.shape_cast %153 : vector<32x32xf32> to vector<2x16x32xf32>
    %c0_67 = arith.constant 0 : index
    %c0_68 = arith.constant 0 : index
    %c0_69 = arith.constant 0 : index
    %155 = vector.load %arg12[%c0_67, %c0_68, %c0_69] : memref<2x16x32xf32, #tpu.memory_space<vmem>>, vector<2x16x32xf32>
    tpu.vector_store %arg12[%c0_67, %c0_68, %c0_69], %154 {strides = array<i32>} : memref<2x16x32xf32, #tpu.memory_space<vmem>>, vector<2x16x32xf32>,
    return
  }
  func.func @transform_0(%arg0: i32, %arg1: i32) -> (i32, i32, i32) {
    %c0_i32 = arith.constant 0 : i32
    %c0_i32_0 = arith.constant 0 : i32
    return %arg0, %arg1, %c0_i32 : i32, i32, i32
  }
  func.func @transform_1(%arg0: i32, %arg1: i32) -> (i32, i32, i32) {
    %c0_i32 = arith.constant 0 : i32
    %c0_i32_0 = arith.constant 0 : i32
    %c0_i32_1 = arith.constant 0 : i32
    return %arg0, %c0_i32, %c0_i32_0 : i32, i32, i32
  }
  func.func @transform_2(%arg0: i32, %arg1: i32) -> (i32, i32) {
    %c0_i32 = arith.constant 0 : i32
    %c0_i32_0 = arith.constant 0 : i32
    %c0_i32_1 = arith.constant 0 : i32
    return %c0_i32, %c0_i32_0 : i32, i32
  }
  func.func @transform_3(%arg0: i32, %arg1: i32) -> (i32, i32) {
    %c0_i32 = arith.constant 0 : i32
    %c0_i32_0 = arith.constant 0 : i32
    %c0_i32_1 = arith.constant 0 : i32
    return %c0_i32, %c0_i32_0 : i32, i32
  }
  func.func @transform_4(%arg0: i32, %arg1: i32) -> (i32, i32) {
    %c0_i32 = arith.constant 0 : i32
    %c0_i32_0 = arith.constant 0 : i32
    %c0_i32_1 = arith.constant 0 : i32
    return %c0_i32, %c0_i32_0 : i32, i32
  }
  func.func @transform_5(%arg0: i32, %arg1: i32) -> (i32, i32) {
    %c0_i32 = arith.constant 0 : i32
    %c0_i32_0 = arith.constant 0 : i32
    %c0_i32_1 = arith.constant 0 : i32
    return %c0_i32, %c0_i32_0 : i32, i32
  }
  func.func @transform_6(%arg0: i32, %arg1: i32) -> (i32, i32) {
    %c0_i32 = arith.constant 0 : i32
    %c0_i32_0 = arith.constant 0 : i32
    %c0_i32_1 = arith.constant 0 : i32
    return %c0_i32, %c0_i32_0 : i32, i32
  }
  func.func @transform_7(%arg0: i32, %arg1: i32) -> (i32, i32) {
    %c0_i32 = arith.constant 0 : i32
    %c0_i32_0 = arith.constant 0 : i32
    %c0_i32_1 = arith.constant 0 : i32
    return %c0_i32, %c0_i32_0 : i32, i32
  }
  func.func @transform_8(%arg0: i32, %arg1: i32) -> (i32, i32) {
    %c0_i32 = arith.constant 0 : i32
    %c0_i32_0 = arith.constant 0 : i32
    %c0_i32_1 = arith.constant 0 : i32
    return %c0_i32, %c0_i32_0 : i32, i32
  }
  func.func @transform_9(%arg0: i32, %arg1: i32) -> (i32, i32) {
    %c0_i32 = arith.constant 0 : i32
    %c0_i32_0 = arith.constant 0 : i32
    %c0_i32_1 = arith.constant 0 : i32
    return %c0_i32, %c0_i32_0 : i32, i32
  }
  func.func @transform_10(%arg0: i32, %arg1: i32) -> (i32, i32, i32) {
    %c0_i32 = arith.constant 0 : i32
    %c0_i32_0 = arith.constant 0 : i32
    return %arg0, %arg1, %c0_i32 : i32, i32, i32
  }
}

</mosaic_0001>

<bundles_post_ra>
// kernel: tpu_custom_call.1
= control target key start
LH: loop header
LB: loop body
LE: loop exit
PB: predicated region body
PF: predicated region fallthrough
CT: control target
= control target key end

     0   :  { %15 = vsyncpa [#allocation6], 0  ;;  %s1798_s0 = inlined_call_operand.hbm [shape: f32[2,16,32], index: 0, kind: input, shape index: {}]   ;;  %s1799_s1 = inlined_call_operand.hbm [shape: f32[2,8,32], index: 1, kind: input, shape index: {}]   ;;  %s1800_s2 = inlined_call_operand.hbm [shape: f32[32,32], index: 2, kind: input, shape index: {}]   ;;  %s1801_s3 = inlined_call_operand.vmem [shape: f32[1,32], index: 3, kind: input, shape index: {}]   ;;  %s1802_s4 = inlined_call_operand.hbm [shape: f32[32,32], index: 4, kind: input, shape index: {}]   ;;  %s1803_s5 = inlined_call_operand.vmem [shape: f32[1,32], index: 5, kind: input, shape index: {}]   ;;  %s1804_s6 = inlined_call_operand.hbm [shape: f32[32,32], index: 6, kind: input, shape index: {}]   ;;  %s1805_s7 = inlined_call_operand.vmem [shape: f32[1,32], index: 7, kind: input, shape index: {}]   ;;  %s1806_s8 = inlined_call_operand.hbm [shape: f32[32,32], index: 8, kind: input, shape index: {}]   ;;  %s1807_s9 = inlined_call_operand.vmem [shape: f32[1,32], index: 9, kind: input, shape index: {}]   ;;  %s1808_s10 = inlined_call_operand.hbm [shape: f32[2,16,32], index: 10, kind: output, shape index: {}]  }
   0x1   :  { %16 = vsyncpa [#allocation9], 0 }
   0x2   :  { %17 = vsyncpa [#allocation12], 0 }
   0x3   :  { %18 = vsyncpa [#allocation15], 0 }
   0x4   :  { %19 = vsyncpa [#allocation7], 0  ;;  %s37_s15 = sshll.u32 %s1799_s1, 4  ;;  %s1433_s16 = smov [#allocation8]   ;;  %s38_s15 = int_to_ptr.hbm [resolvable:$true] %s37_s15 }
   0x5   :  { %s39_s17 = sshll.u32 %s1433_s16, 4  ;;  %s65_s20 = sshll.u32 %s1802_s4, 4  ;;  %s40_s17 = int_to_ptr.vmem [resolvable:$true] %s39_s17  ;;  %s66_s20 = int_to_ptr.hbm [resolvable:$true] %s65_s20 }
   0x6   :  { %s1434_s21 = smov 128   ;;  %s1435_s22 = smov 8  }
   0x7   :  { %45 = dma.hbm_to_vmem [thread:$0]  %s38_s15, 256, %s40_s17, [#allocation9], %s1434_s21, %s1434_s21, %s1435_s22  }
   0x8   :  { %s1436_s23 = smov [#allocation11]   ;;  %s24_s1 = sshll.u32 %s1798_s0, 4  ;;  %s25_s1 = int_to_ptr.hbm [resolvable:$true] %s24_s1 }
   0x9   :  { %s67_s24 = sshll.u32 %s1436_s23, 4  ;;  %s50_s28 = sshll.u32 %s1800_s2, 4  ;;  %s68_s24 = int_to_ptr.vmem [resolvable:$true] %s67_s24  ;;  %s51_s28 = int_to_ptr.hbm [resolvable:$true] %s50_s28 }
   0xa   :  { %73 = dma.hbm_to_vmem [thread:$0]  %s66_s20, 512, %s68_s24, [#allocation12], %s1434_s21, %s1434_s21, %s1435_s22  }
   0xb   :  { %s1437_s29 = smov [#allocation5]   ;;  %s1438_s11 = smov [#allocation10]  }
   0xc   :  { %s26_s30 = sshll.u32 %s1437_s29, 4  ;;  %s52_s0 = sshll.u32 %s1438_s11, 4  ;;  %s27_s30 = int_to_ptr.vmem [resolvable:$true] %s26_s30  ;;  %s53_s0 = int_to_ptr.vmem [resolvable:$true] %s52_s0 }
   0xd   :  { %32 = dma.hbm_to_vmem [thread:$0]  %s25_s1, 512, %s27_s30, [#allocation6], %s1434_s21, %s1434_s21, %s1435_s22  }
   0xe   :  { %s80_s14 = sshll.u32 %s1804_s6, 4  ;;  %s95_s16 = sshll.u32 %s1806_s8, 4  ;;  %s81_s14 = int_to_ptr.hbm [resolvable:$true] %s80_s14  ;;  %s96_s16 = int_to_ptr.hbm [resolvable:$true] %s95_s16 }
   0xf   :  { %58 = dma.hbm_to_vmem [thread:$0]  %s51_s28, 512, %s53_s0, [#allocation9], %s1434_s21, %s1434_s21, %s1435_s22  }
  0x10   :  { %s1439_s17 = smov [#allocation13]   ;;  %s1440_s19 = smov [#allocation14]  }
  0x11   :  { %s82_s18 = sshll.u32 %s1439_s17, 4  ;;  %s97_s6 = sshll.u32 %s1440_s19, 4  ;;  %s83_s18 = int_to_ptr.vmem [resolvable:$true] %s82_s18  ;;  %s98_s6 = int_to_ptr.vmem [resolvable:$true] %s97_s6 }
  0x12   :  { %88 = dma.hbm_to_vmem [thread:$0]  %s81_s14, 512, %s83_s18, [#allocation12], %s1434_s21, %s1434_s21, %s1435_s22  }
  0x13   :  { %103 = dma.hbm_to_vmem [thread:$0]  %s96_s16, 512, %s98_s6, [#allocation15], %s1434_s21, %s1434_s21, %s1435_s22  }
  0x14   :  { %1423 = dma.done.wait [#allocation6], 512  }
  0x15   :  { %1424 = vsyncadd [#allocation6], 4294966784 }
  0x16   :  { %1425 = dma.done.wait [#allocation9], 768  }
  0x17   :  { %1426 = vsyncadd [#allocation9], 4294966528 }
  0x18   :  { %1427 = dma.done.wait [#allocation12], 1024  }
  0x19   :  { %1428 = vsyncadd [#allocation12], 4294966272 }
  0x1a   :  { %1429 = dma.done.wait [#allocation15], 512  }
  0x1b   :  { %1430 = vsyncadd [#allocation15], 4294966784  ;;  %v137_v0 = vld [vmem:[#allocation11 + $0x18] sm:$0xff]  ;;  %v136_v1 = vld [vmem:[#allocation11 + $0x10] sm:$0xff]  ;;  %vm149_vm0 = vcmask 261120   ;;  %vm265_vm1 = vcmask 64512  }
  0x1c   :  { %168 = vmatpush.msra.mxu0 %v137_v0  ;;  %v212_v2 = vld [vmem:[#allocation10 + $0x18] sm:$0xff]  ;;  %1168 = vmatpush.msra.mxu1 %v137_v0  ;;  %v135_v3 = vld [vmem:[#allocation11 + $0x8] sm:$0xff]  ;;  %v211_v4 = vld [vmem:[#allocation10 + $0x10] sm:$0xff]  ;;  %s1444_s1 = smov 16   ;;  %s1445_s4 = smov 24   ;;  %vm449_vm2 = vcmask 130112  }
  0x1d   :  { %246 = vmatpush.msra.mxu2 %v212_v2  ;;  %v210_v5 = vld [vmem:[#allocation10 + $0x8] sm:$0xff]  ;;  %v134_v6 = vld [vmem:[#allocation11] sm:$0xff]  ;;  %v144_v7 = vld [vmem:[#allocation8] sm:$0xff]  ;;  %vm549_vm3 = vcmask 195712   ;;  %vm649_vm4 = vcmask 261312   ;;  %s1446_s29 = smov [#allocation16]  }
  0x1e   :  { %169 = vmatpush.msra.mxu0 %v136_v1  ;;  %1169 = vmatpush.msra.mxu1 %v136_v1  ;;  %v209_v8 = vld [vmem:[#allocation10] sm:$0xff]  ;;  %v214_v9 = vld [vmem:[#allocation5] sm:$0xff]  ;;  %v145_v10 = vld [vmem:[#allocation8 + $0x8] sm:$0xff]  ;;  %s1098_s30 = sshll.u32 %s1446_s29, 4  ;;  %s1100_s12 = sshll.u32 %s1808_s10, 4  ;;  %s1099_s30 = int_to_ptr.vmem [resolvable:$true] %s1098_s30  ;;  %s1101_s12 = int_to_ptr.hbm [resolvable:$true] %s1100_s12 }
  0x1f   :  { %247 = vmatpush.msra.mxu2 %v211_v4  ;;  %v141_v11 = vld [vmem:[#allocation13 + $0x18] sm:$0xff]  ;;  %v140_v12 = vld [vmem:[#allocation13 + $0x10] sm:$0xff]  ;;  %v139_v13 = vld [vmem:[#allocation13 + $0x8] sm:$0xff] }
  0x20   :  { %170 = vmatpush.msra.mxu0 %v135_v3  ;;  %1170 = vmatpush.msra.mxu1 %v135_v3  ;;  %v138_v14 = vld [vmem:[#allocation13] sm:$0xff]  ;;  %v215_v15 = vld [vmem:[#allocation5 + $0x8] sm:$0xff]  ;;  %v217_v17 = vld [vmem:[#allocation5 + $0x18] sm:$0xff] }
  0x21   :  { %248 = vmatpush.msra.mxu2 %v210_v5  ;;  %v216_v16 = vld [vmem:[#allocation5 + $0x10] sm:$0xff]  ;;  %v1187_v18 = vld [vmem:[%s1803_s5] ss:$0 sm:$0xff]  ;;  %s1441_s5 = smov 120  }
  0x22   :  { %171 = vmatpush.msra.mxu0 %v134_v6  ;;  %1171 = vmatpush.msra.mxu1 %v134_v6  ;;  %v1188_v23 = vld [vmem:[%s1801_s3] ss:$0 sm:$0xff]  ;;  %s1442_s3 = smov 104  }
  0x23   :  { %1116 = vmatmul.msk.f32.vlgmr.msra.gmra.mxu0 %vm149_vm0, %v144_v7  ;;  %249 = vmatpush.msra.mxu2 %v209_v8  ;;  %v1557_v24 = vld [vmem:[%s1805_s7] ss:$0 sm:$0xff]  ;;  %s1443_s7 = smov 112  }
  0x24   :  { %1120 = vmatmul.msk.f32.vlgmr.msra.gmra.mxu2 %vm149_vm0, %v214_v9  ;;  %1117 = vmatmul.msk.f32.vlgmr.msra.gmra.mxu1 %vm149_vm0, %v145_v10 }
  0x25   :  { %194 = vmatpush.msrb.mxu1 %v141_v11 }
  0x27   :  { %195 = vmatpush.msrb.mxu1 %v140_v12 }
  0x29   :  { %196 = vmatpush.msrb.mxu1 %v139_v13 }
  0x2b   :  { %197 = vmatpush.msrb.mxu1 %v138_v14 }
  0x2c   :  { %1121 = vmatmul.msk.f32.gmra.mxu2 %vm149_vm0, %v215_v15  ;;  %1118 = vmatmul.msk.f32.vlgmr.msrb.gmra.mxu1 %vm149_vm0, %v144_v7 }
  0x34   :  { %1122 = vmatmul.msk.f32.gmra.mxu2 %vm149_vm0, %v216_v16  ;;  %1119 = vmatmul.msk.f32.gmra.mxu1 %vm149_vm0, %v145_v10 }
  0x3c   :  { %1123 = vmatmul.msk.f32.gmra.mxu2 %vm149_vm0, %v217_v17 }
  0xa0   :  { %v173_v19 = vpop.f32.mrf.mxu0 }
  0xa1   :  { %v174_v20 = vadd.f32 %v1187_v18, %v173_v19  ;;  %v176_v21 = vpop.f32.mrf.mxu1 }
  0xa2   :  { %v177_v22 = vadd.f32 %v1187_v18, %v176_v21 }
  0xa3   :  { %205 = vst.msk [vmem:[#allocation2] sm:$0xff] %vm149_vm0, %v174_v20 }
  0xa4   :  { %206 = vst.msk [vmem:[#allocation2 + $0x8] sm:$0xff] %vm149_vm0, %v177_v22 }
  0xa7   :  { %v251_v25 = vpop.f32.mrf.mxu2 }
  0xa8   :  { %v252_v27 = vadd.f32 %v1188_v23, %v251_v25 }
  0xa9   :  { %v199_v26 = vpop.f32.mrf.mxu1 }
  0xaa   :  { %v263_v28 = vld [vmem:[#allocation2] sm:$0xff]  ;;  %v200_v29 = vadd.f32 %v1557_v24, %v199_v26 }
  0xab   :  { %355 = vrot.lane.b32.xlu0 %v263_v28, %s1441_s5  ;;  %1124 = vmatpush.xpose.msk.msrb.mxu0 %vm265_vm1, %v263_v28  ;;  %v652_v36 = vld [vmem:[#allocation2 + $0x8] sm:$0xff] }
  0xac   :  { %207 = vst.msk [vmem:[#allocation3] sm:$0xff] %vm149_vm0, %v200_v29 }
  0xae   :  { %1125 = vmatmul.msk.f32.vlgmr.msrb.gmra.mxu0 %vm265_vm1, %v252_v27 }
  0xaf   :  { %v254_v30 = vpop.f32.mrf.mxu2 }
  0xb0   :  { %v255_v31 = vadd.f32 %v1188_v23, %v254_v30 }
  0xb1   :  { %v202_v4 = vpop.f32.mrf.mxu1 }
  0xb2   :  { %353 = vrot.lane.b32.xlu1 %v255_v31, %s1441_s5  ;;  %v203_v5 = vadd.f32 %v1557_v24, %v202_v4 }
  0xb3   :  { %351 = vrot.lane.b32.xlu0 %v252_v27, %s1441_s5  ;;  %v1566_v32 = vld [vmem:[#allocation3] sm:$0xff] }
  0xb4   :  { %337 = vmatpush.msrb.mxu2 %v1566_v32  ;;  %1172 = vmatpush.msra.mxu3 %v1566_v32  ;;  %208 = vst.msk [vmem:[#allocation3 + $0x8] sm:$0xff] %vm149_vm0, %v203_v5 }
  0xb6   :  { %1126 = vmatmul.msk.f32.gmra.mxu0 %vm265_vm1, %v255_v31 }
  0xb7   :  { %v257_v33 = vpop.f32.mrf.mxu2 }
  0xb8   :  { %v1582_v37 = vadd.f32 %v1188_v23, %v257_v33 }
  0xbb   :  { %405 = vrot.lane.b32.xlu0 %v1566_v32, %s1441_s5  ;;  %v1626_v6 = vld [vmem:[#allocation3 + $0x8] sm:$0xff] }
  0xbf   :  { %v260_v34 = vpop.f32.mrf.mxu2 }
  0xc0   :  { %v1577_v35 = vadd.f32 %v1188_v23, %v260_v34 }
  0xc3   :  { %556 = vrot.lane.b32.xlu0 %v263_v28, %s1442_s3 }
  0xcb   :  { %452 = vrot.lane.b32.xlu0 %v252_v27, %s1443_s7 }
  0xd3   :  { %552 = vrot.lane.b32.xlu0 %v252_v27, %s1442_s3 }
  0xdb   :  { %554 = vrot.lane.b32.xlu0 %v255_v31, %s1442_s3 }
  0xe3   :  { %741 = vrot.lane.b32.xlu0 %v1577_v35, %s1441_s5 }
  0xeb   :  { %942 = vrot.lane.b32.xlu0 %v652_v36, %s1442_s3 }
  0xf3   :  { %938 = vrot.lane.b32.xlu0 %v1582_v37, %s1442_s3 }
 0x11d   :  { %v356_v38 = vpop.permute.xlu0 %355 }
 0x11e   :  { %1129 = vmatpush.xpose.msk.msra.mxu0 %vm265_vm1, %v356_v38 }
 0x124   :  { %v354_v41 = vpop.permute.xlu1 %353 }
 0x125   :  { %v352_v39 = vpop.permute.xlu0 %351 }
 0x126   :  { %1130 = vmatmul.msk.f32.vlgmr.msra.gmra.mxu0 %vm265_vm1, %v352_v39 }
 0x12b   :  { %v292_v40 = vpop.f32.mrf.mxu0 }
 0x12c   :  { %v298_v42 = vsel %vm265_vm1, %v292_v40, -inf }
 0x12d   :  { %v406_v43 = vpop.permute.xlu0 %405  ;;  %299 = vmax.xlane.f32.xlu0 %v298_v42 }
 0x12e   :  { %1131 = vmatmul.msk.f32.gmra.mxu0 %vm265_vm1, %v354_v41  ;;  %429 = vmatpush.msra.mxu1 %v406_v43 }
 0x133   :  { %v295_v44 = vpop.f32.mrf.mxu0 }
 0x134   :  { %v301_v45 = vsel %vm265_vm1, %v295_v44, -inf }
 0x135   :  { %v557_v46 = vpop.permute.xlu0 %556  ;;  %302 = vmax.xlane.f32.xlu2 %v301_v45 }
 0x136   :  { %1139 = vmatpush.xpose.msk.msrb.mxu1 %vm265_vm1, %v557_v46 }
 0x13d   :  { %v453_v47 = vpop.permute.xlu0 %452 }
 0x141   :  { %605 = vrot.lane.b32.xlu0 %v1566_v32, %s1442_s3 }
 0x145   :  { %v553_v48 = vpop.permute.xlu0 %552 }
 0x14d   :  { %456 = vrot.lane.b32.xlu2 %v263_v28, %s1443_s7  ;;  %v1596_v49 = vpop.permute.xlu0 %554 }
 0x155   :  { %454 = vrot.lane.b32.xlu2 %v255_v31, %s1443_s7  ;;  %v1598_v50 = vpop.permute.xlu0 %741 }
 0x15d   :  { %v943_v51 = vpop.permute.xlu0 %942 }
 0x165   :  { %v1600_v52 = vpop.permute.xlu0 %938 }
 0x1a0   :  { %v300_v53 = vpop.xlane.xlu0 %299 }
 0x1a1   :  { %v304_v54 = vsub.f32 %v292_v40, %v300_v53 }
 0x1a3   :  { %v306_v55 = vmul.f32 1.442695, %v304_v54  ;;  %v380_v56 = vpop.f32.mrf.mxu0 }
 0x1a4   :  { %v386_v57 = vsel %vm265_vm1, %v380_v56, -inf }
 0x1a5   :  { %1191 = vpow2.f32 %v306_v55  ;;  %387 = vmax.xlane.f32.xlu1 %v386_v57 }
 0x1a8   :  { %v303_v58 = vpop.xlane.xlu2 %302 }
 0x1a9   :  { %v305_v59 = vsub.f32 %v295_v44, %v303_v58 }
 0x1ab   :  { %v1603_v60 = vpop.eup %1191  ;;  %v308_v61 = vmul.f32 1.442695, %v305_v59  ;;  %v383_v62 = vpop.f32.mrf.mxu0 }
 0x1ac   :  { %1127 = vmatmul.msk.f32.vlgmr.msrb.gmra.mxu2 %vm265_vm1, %v1603_v60  ;;  %v389_v63 = vsel %vm265_vm1, %v383_v62, -inf }
 0x1ad   :  { %1193 = vpow2.f32 %v308_v61  ;;  %390 = vmax.xlane.f32.xlu2 %v389_v63 }
 0x1b0   :  { %v457_v0 = vpop.permute.xlu2 %456 }
 0x1b1   :  { %1134 = vmatpush.xpose.msk.msrb.mxu3 %vm265_vm1, %v457_v0 }
 0x1b3   :  { %v1609_v1 = vpop.eup %1193  ;;  %v606_v3 = vpop.permute.xlu0 %605 }
 0x1b4   :  { %1128 = vmatmul.msk.f32.vlgmr.msra.gmra.mxu3 %vm265_vm1, %v1609_v1  ;;  %629 = vmatpush.msra.mxu2 %v606_v3 }
 0x1b5   :  { %1144 = vmatpush.xpose.msk.msra.mxu3 %vm265_vm1, %v652_v36 }
 0x1b8   :  { %v455_v2 = vpop.permute.xlu2 %454 }
 0x1bc   :  { %1135 = vmatmul.msk.f32.vlgmr.msrb.gmra.mxu3 %vm265_vm1, %v453_v47 }
 0x1be   :  { %739 = vrot.lane.b32.xlu1 %v1582_v37, %s1441_s5 }
 0x1c4   :  { %1136 = vmatmul.msk.f32.gmra.mxu3 %vm265_vm1, %v455_v2 }
 0x1c5   :  { %743 = vrot.lane.b32.xlu2 %v652_v36, %s1441_s5 }
 0x1c6   :  { %940 = vrot.lane.b32.xlu1 %v1577_v35, %s1442_s3 }
 0x1cc   :  { %1145 = vmatmul.msk.f32.vlgmr.msra.gmra.mxu3 %vm265_vm1, %v1582_v37 }
 0x1cd   :  { %843 = vrot.lane.b32.xlu2 %v652_v36, %s1443_s7 }
 0x1ce   :  { %793 = vrot.lane.b32.xlu1 %v1626_v6, %s1441_s5 }
 0x1d4   :  { %1146 = vmatmul.msk.f32.gmra.mxu3 %vm265_vm1, %v1577_v35 }
 0x1d5   :  { %839 = vrot.lane.b32.xlu2 %v1582_v37, %s1443_s7 }
 0x1dd   :  { %841 = vrot.lane.b32.xlu2 %v1577_v35, %s1443_s7 }
 0x1e5   :  { %505 = vrot.lane.b32.xlu2 %v1566_v32, %s1443_s7 }
 0x218   :  { %v388_v7 = vpop.xlane.xlu1 %387 }
 0x219   :  { %v392_v8 = vsub.f32 %v380_v56, %v388_v7  ;;  %v310_v7 = vsel %vm265_vm1, %v1603_v60, 0.0 }
 0x21b   :  { %v394_v9 = vmul.f32 1.442695, %v392_v8 }
 0x21d   :  { %1195 = vpow2.f32 %v394_v9  ;;  %v313_v9 = vsel %vm265_vm1, %v1609_v1, 0.0 }
 0x220   :  { %v391_v10 = vpop.xlane.xlu2 %390 }
 0x221   :  { %v393_v11 = vsub.f32 %v383_v62, %v391_v10 }
 0x223   :  { %v1638_v12 = vpop.eup %1195  ;;  %v396_v13 = vmul.f32 1.442695, %v393_v11 }
 0x224   :  { %1132 = vmatmul.msk.f32.vlgmr.msra.gmra.mxu1 %vm265_vm1, %v1638_v12  ;;  %v398_v3 = vsel %vm265_vm1, %v1638_v12, 0.0 }
 0x225   :  { %1197 = vpow2.f32 %v396_v13 }
 0x228   :  { %v744_v14 = vpop.permute.xlu2 %743 }
 0x229   :  { %1149 = vmatpush.xpose.msk.msra.mxu1 %vm265_vm1, %v744_v14 }
 0x22b   :  { %v1643_v15 = vpop.eup %1197 }
 0x22c   :  { %1133 = vmatmul.msk.f32.gmra.mxu1 %vm265_vm1, %v1643_v15  ;;  %v401_v10 = vsel %vm265_vm1, %v1643_v15, 0.0 }
 0x230   :  { %v844_v16 = vpop.permute.xlu2 %843  ;;  %v740_v22 = vpop.permute.xlu1 %739 }
 0x231   :  { %1154 = vmatpush.xpose.msk.msrb.mxu3 %vm265_vm1, %v844_v16 }
 0x234   :  { %1140 = vmatmul.msk.f32.vlgmr.msrb.gmra.mxu1 %vm265_vm1, %v553_v48 }
 0x235   :  { %1159 = vmatpush.xpose.msk.msrb.mxu1 %vm265_vm1, %v943_v51 }
 0x237   :  { %v1650_v17 = vpop.f32.mrf.mxu3 }
 0x238   :  { %v840_v18 = vpop.permute.xlu2 %839  ;;  %v941_v30 = vpop.permute.xlu1 %940 }
 0x239   :  { %1155 = vmatmul.msk.f32.vlgmr.msrb.gmra.mxu3 %vm265_vm1, %v840_v18 }
 0x23c   :  { %1141 = vmatmul.msk.f32.gmra.mxu1 %vm265_vm1, %v1596_v49 }
 0x23f   :  { %v481_v19 = vpop.f32.mrf.mxu3 }
 0x240   :  { %v842_v20 = vpop.permute.xlu2 %841  ;;  %v487_v21 = vsel %vm265_vm1, %v481_v19, -inf  ;;  %v794_v31 = vpop.permute.xlu1 %793 }
 0x241   :  { %488 = vmax.xlane.f32.xlu1 %v487_v21  ;;  %1156 = vmatmul.msk.f32.gmra.mxu3 %vm265_vm1, %v842_v20 }
 0x242   :  { %817 = vmatpush.msrb.mxu2 %v794_v31 }
 0x244   :  { %1150 = vmatmul.msk.f32.vlgmr.msra.gmra.mxu1 %vm265_vm1, %v740_v22 }
 0x247   :  { %v484_v23 = vpop.f32.mrf.mxu3 }
 0x248   :  { %v506_v24 = vpop.permute.xlu2 %505  ;;  %v490_v25 = vsel %vm265_vm1, %v484_v23, -inf }
 0x249   :  { %491 = vmax.xlane.f32.xlu1 %v490_v25  ;;  %529 = vmatpush.msrb.mxu0 %v506_v24 }
 0x24b   :  { %725 = vmatpush.msra.mxu0 %v1626_v6 }
 0x24c   :  { %1151 = vmatmul.msk.f32.gmra.mxu1 %vm265_vm1, %v1598_v50 }
 0x24f   :  { %v680_v26 = vpop.f32.mrf.mxu3 }
 0x250   :  { %v686_v27 = vsel %vm265_vm1, %v680_v26, -inf }
 0x251   :  { %687 = vmax.xlane.f32.xlu1 %v686_v27 }
 0x254   :  { %1160 = vmatmul.msk.f32.vlgmr.msrb.gmra.mxu1 %vm265_vm1, %v1600_v52 }
 0x257   :  { %v683_v28 = vpop.f32.mrf.mxu3 }
 0x258   :  { %v689_v29 = vsel %vm265_vm1, %v683_v28, -inf }
 0x259   :  { %690 = vmax.xlane.f32.xlu2 %v689_v29 }
 0x25c   :  { %1161 = vmatmul.msk.f32.gmra.mxu1 %vm265_vm1, %v941_v30 }
 0x2a1   :  { %v1667_v32 = vpop.f32.mrf.mxu1 }
 0x2a9   :  { %v1669_v33 = vpop.f32.mrf.mxu1 }
 0x2b1   :  { %v1671_v34 = vpop.f32.mrf.mxu1 }
 0x2b2   :  { %v587_v35 = vsel %vm265_vm1, %v1671_v34, -inf }
 0x2b3   :  { %588 = vmax.xlane.f32.xlu2 %v587_v35 }
 0x2b4   :  { %v489_v36 = vpop.xlane.xlu1 %488 }
 0x2b5   :  { %v493_v37 = vsub.f32 %v481_v19, %v489_v36 }
 0x2b7   :  { %v495_v38 = vmul.f32 1.442695, %v493_v37 }
 0x2b9   :  { %1199 = vpow2.f32 %v495_v38  ;;  %v584_v39 = vpop.f32.mrf.mxu1 }
 0x2ba   :  { %v590_v40 = vsel %vm265_vm1, %v584_v39, -inf }
 0x2bb   :  { %591 = vmax.xlane.f32.xlu2 %v590_v40 }
 0x2bc   :  { %v492_v41 = vpop.xlane.xlu1 %491  ;;  %v1676_v42 = vpop.f32.mrf.mxu3 }
 0x2bd   :  { %v494_v43 = vsub.f32 %v484_v23, %v492_v41  ;;  %v874_v44 = vsel %vm265_vm1, %v1676_v42, -inf }
 0x2be   :  { %875 = vmax.xlane.f32.xlu0 %v874_v44 }
 0x2bf   :  { %v1200_v45 = vpop.eup %1199  ;;  %v497_v46 = vmul.f32 1.442695, %v494_v43 }
 0x2c0   :  { %1137 = vmatmul.msk.f32.vlgmr.msrb.gmra.mxu0 %vm265_vm1, %v1200_v45  ;;  %v499_v8 = vsel %vm265_vm1, %v1200_v45, 0.0 }
 0x2c1   :  { %1201 = vpow2.f32 %v497_v46  ;;  %v768_v47 = vpop.f32.mrf.mxu1 }
 0x2c2   :  { %v774_v48 = vsel %vm265_vm1, %v768_v47, -inf }
 0x2c3   :  { %775 = vmax.xlane.f32.xlu1 %v774_v48 }
 0x2c4   :  { %v688_v49 = vpop.xlane.xlu1 %687  ;;  %v1682_v50 = vpop.f32.mrf.mxu3 }
 0x2c5   :  { %v692_v51 = vsub.f32 %v680_v26, %v688_v49  ;;  %v877_v52 = vsel %vm265_vm1, %v1682_v50, -inf }
 0x2c6   :  { %878 = vmax.xlane.f32.xlu0 %v877_v52 }
 0x2c7   :  { %v1202_v53 = vpop.eup %1201  ;;  %v694_v54 = vmul.f32 1.442695, %v692_v51 }
 0x2c8   :  { %1138 = vmatmul.msk.f32.gmra.mxu0 %vm265_vm1, %v1202_v53  ;;  %v502_v5 = vsel %vm265_vm1, %v1202_v53, 0.0 }
 0x2c9   :  { %1203 = vpow2.f32 %v694_v54  ;;  %v1687_v55 = vpop.f32.mrf.mxu1 }
 0x2ca   :  { %v777_v56 = vsel %vm265_vm1, %v1687_v55, -inf }
 0x2cc   :  { %v691_v57 = vpop.xlane.xlu2 %690 }
 0x2cd   :  { %v693_v58 = vsub.f32 %v683_v28, %v691_v57 }
 0x2ce   :  { %778 = vmax.xlane.f32.xlu0 %v777_v56 }
 0x2cf   :  { %v1691_v59 = vpop.eup %1203  ;;  %v696_v61 = vmul.f32 1.442695, %v693_v58  ;;  %v339_v58 = vpop.f32.mrf.mxu2 }
 0x2d0   :  { %1147 = vmatmul.msk.f32.vlgmr.msra.gmra.mxu0 %vm265_vm1, %v1691_v59 }
 0x2d1   :  { %1205 = vpow2.f32 %v696_v61  ;;  %v1695_v62 = vpop.f32.mrf.mxu1 }
 0x2d2   :  { %v973_v63 = vsel %vm265_vm1, %v1695_v62, -inf }
 0x2d3   :  { %991 = vrot.lane.b32.xlu2 %v1626_v6, %s1442_s3  ;;  %974 = vmax.xlane.f32.xlu1 %v973_v63 }
 0x2d7   :  { %v1701_v0 = vpop.eup %1205 }
 0x2d8   :  { %1148 = vmatmul.msk.f32.gmra.mxu0 %vm265_vm1, %v1701_v0 }
 0x2d9   :  { %v1705_v2 = vpop.f32.mrf.mxu1 }
 0x2da   :  { %v976_v4 = vsel %vm265_vm1, %v1705_v2, -inf }
 0x2db   :  { %399 = vadd.xlane.f32.xlu1 %v398_v3  ;;  %977 = vmax.xlane.f32.xlu0 %v976_v4 }
 0x2e3   :  { %503 = vadd.xlane.f32.xlu1 %v502_v5 }
 0x2eb   :  { %311 = vadd.xlane.f32.xlu1 %v310_v7 }
 0x2ef   :  { %892 = vrot.lane.b32.xlu0 %v1626_v6, %s1443_s7 }
 0x2fc   :  { %500 = vadd.xlane.f32.xlu2 %v499_v8 }
 0x304   :  { %314 = vadd.xlane.f32.xlu2 %v313_v9 }
 0x319   :  { %402 = vadd.xlane.f32.xlu0 %v401_v10  ;;  %v698_v10 = vsel %vm265_vm1, %v1691_v59, 0.0 }
 0x326   :  { %v589_v11 = vpop.xlane.xlu2 %588 }
 0x327   :  { %v593_v12 = vsub.f32 %v1671_v34, %v589_v11 }
 0x329   :  { %v595_v13 = vmul.f32 1.442695, %v593_v12 }
 0x32b   :  { %1207 = vpow2.f32 %v595_v13 }
 0x32e   :  { %v592_v60 = vpop.xlane.xlu2 %591 }
 0x32f   :  { %v594_v14 = vsub.f32 %v584_v39, %v592_v60 }
 0x331   :  { %v1208_v16 = vpop.eup %1207  ;;  %v597_v6 = vmul.f32 1.442695, %v594_v14  ;;  %v876_v18 = vpop.xlane.xlu0 %875 }
 0x332   :  { %v880_v19 = vsub.f32 %v1676_v42, %v876_v18  ;;  %1142 = vmatmul.msk.f32.vlgmr.msra.gmra.mxu2 %vm265_vm1, %v1208_v16  ;;  %v599_v37 = vsel %vm265_vm1, %v1208_v16, 0.0 }
 0x333   :  { %1209 = vpow2.f32 %v597_v6 }
 0x334   :  { %v882_v1 = vmul.f32 1.442695, %v880_v19 }
 0x336   :  { %1211 = vpow2.f32 %v882_v1  ;;  %v776_v20 = vpop.xlane.xlu1 %775  ;;  %v992_v15 = vpop.permute.xlu2 %991 }
 0x337   :  { %v780_v21 = vsub.f32 %v768_v47, %v776_v20  ;;  %1015 = vmatpush.msra.mxu2 %v992_v15 }
 0x339   :  { %v1210_v22 = vpop.eup %1209  ;;  %v782_v23 = vmul.f32 1.442695, %v780_v21  ;;  %v879_v24 = vpop.xlane.xlu0 %878 }
 0x33a   :  { %v881_v25 = vsub.f32 %v1682_v50, %v879_v24  ;;  %1143 = vmatmul.msk.f32.gmra.mxu2 %vm265_vm1, %v1210_v22  ;;  %v602_v42 = vsel %vm265_vm1, %v1210_v22, 0.0 }
 0x33b   :  { %1213 = vpow2.f32 %v782_v23 }
 0x33c   :  { %v1212_v26 = vpop.eup %1211  ;;  %v884_v27 = vmul.f32 1.442695, %v881_v25 }
 0x33d   :  { %v886_v28 = vsel %vm265_vm1, %v1212_v26, 0.0  ;;  %v531_v54 = vpop.f32.mrf.mxu0 }
 0x33e   :  { %1215 = vpow2.f32 %v884_v27  ;;  %887 = vadd.xlane.f32.xlu1 %v886_v28  ;;  %v701_v27 = vsel %vm265_vm1, %v1701_v0, 0.0 }
 0x341   :  { %v1214_v29 = vpop.eup %1213  ;;  %v779_v30 = vpop.xlane.xlu0 %778 }
 0x342   :  { %v781_v31 = vsub.f32 %v1687_v55, %v779_v30  ;;  %1152 = vmatmul.msk.f32.vlgmr.msrb.gmra.mxu2 %vm265_vm1, %v1214_v29  ;;  %v786_v50 = vsel %vm265_vm1, %v1214_v29, 0.0 }
 0x344   :  { %v1216_v34 = vpop.eup %1215  ;;  %v784_v35 = vmul.f32 1.442695, %v781_v31 }
 0x345   :  { %v889_v36 = vsel %vm265_vm1, %v1216_v34, 0.0  ;;  %v534_v63 = vpop.f32.mrf.mxu0 }
 0x346   :  { %1217 = vpow2.f32 %v784_v35  ;;  %v975_v38 = vpop.xlane.xlu1 %974  ;;  %890 = vadd.xlane.f32.xlu2 %v889_v36  ;;  %600 = vadd.xlane.f32.xlu1 %v599_v37 }
 0x347   :  { %v979_v39 = vsub.f32 %v1695_v62, %v975_v38 }
 0x349   :  { %v981_v40 = vmul.f32 1.442695, %v979_v39 }
 0x34b   :  { %1219 = vpow2.f32 %v981_v40 }
 0x34c   :  { %v1218_v41 = vpop.eup %1217 }
 0x34d   :  { %1153 = vmatmul.msk.f32.gmra.mxu2 %vm265_vm1, %v1218_v41  ;;  %v789_v11 = vsel %vm265_vm1, %v1218_v41, 0.0  ;;  %v727_v19 = vpop.f32.mrf.mxu0  ;;  %v1040_v41 = vld [vmem:[#allocation14 + $0x18] sm:$0xff] }
 0x34e   :  { %v400_v43 = vpop.xlane.xlu1 %399  ;;  %v978_v44 = vpop.xlane.xlu0 %977  ;;  %603 = vadd.xlane.f32.xlu1 %v602_v42  ;;  %1073 = vmatpush.msra.mxu3 %v1040_v41 }
 0x34f   :  { %1221 = vrcp.f32 %v400_v43  ;;  %v980_v45 = vsub.f32 %v1705_v2, %v978_v44  ;;  %v1039_v43 = vld [vmem:[#allocation14 + $0x10] sm:$0xff]  ;;  %v1038_v44 = vld [vmem:[#allocation14 + $0x8] sm:$0xff] }
 0x350   :  { %1074 = vmatpush.msra.mxu3 %v1039_v43 }
 0x351   :  { %v1220_v46 = vpop.eup %1219  ;;  %v983_v47 = vmul.f32 1.442695, %v980_v45 }
 0x352   :  { %v985_v48 = vsel %vm265_vm1, %v1220_v46, 0.0  ;;  %1075 = vmatpush.msra.mxu3 %v1038_v44 }
 0x353   :  { %986 = vadd.xlane.f32.xlu2 %v985_v48  ;;  %1223 = vpow2.f32 %v983_v47 }
 0x355   :  { %v1222_v49 = vpop.eup %1221  ;;  %1162 = vmatmul.msk.f32.vlgmr.msra.gmra.mxu2 %vm265_vm1, %v1220_v46  ;;  %v1756_v1 = vpop.f32.mrf.mxu0  ;;  %v1037_v46 = vld [vmem:[#allocation14] sm:$0xff] }
 0x356   :  { %v504_v51 = vpop.xlane.xlu1 %503  ;;  %787 = vadd.xlane.f32.xlu1 %v786_v50  ;;  %v439_v52 = vmul.f32 %v1222_v49, %v1667_v32  ;;  %1076 = vmatpush.msra.mxu3 %v1037_v46 }
 0x358   :  { %443 = vrot.lane.b32.xlu0 %v439_v52, %s1435_s22 }
 0x359   :  { %v1224_v53 = vpop.eup %1223 }
 0x35a   :  { %v988_v9 = vsel %vm265_vm1, %v1224_v53, 0.0 }
 0x35d   :  { %1163 = vmatmul.msk.f32.gmra.mxu2 %vm265_vm1, %v1224_v53 }
 0x35e   :  { %v312_v55 = vpop.xlane.xlu1 %311 }
 0x35f   :  { %1225 = vrcp.f32 %v312_v55 }
 0x360   :  { %1227 = vrcp.f32 %v504_v51 }
 0x361   :  { %v893_v56 = vpop.permute.xlu0 %892 }
 0x362   :  { %916 = vmatpush.msrb.mxu0 %v893_v56 }
 0x363   :  { %1157 = vmatmul.msk.f32.vlgmr.msrb.gmra.mxu0 %vm265_vm1, %v1212_v26 }
 0x365   :  { %v1226_v57 = vpop.eup %1225 }
 0x366   :  { %v1228_v61 = vpop.eup %1227  ;;  %v347_v62 = vmul.f32 %v1226_v57, %v339_v58 }
 0x367   :  { %v540_v32 = vmul.f32 %v1228_v61, %v534_v63 }
 0x368   :  { %349 = vst.msk [vmem:[#allocation4] sm:$0xff] %vm265_vm1, %v347_v62 }
 0x36b   :  { %545 = vrot.lane.b32.xlu2 %v540_v32, %s1444_s1  ;;  %1158 = vmatmul.msk.f32.gmra.mxu0 %vm265_vm1, %v1216_v34 }
 0x36f   :  { %v501_v2 = vpop.xlane.xlu2 %500 }
 0x370   :  { %1229 = vrcp.f32 %v501_v2 }
 0x376   :  { %v1230_v3 = vpop.eup %1229 }
 0x377   :  { %v315_v4 = vpop.xlane.xlu2 %314  ;;  %v539_v5 = vmul.f32 %v1230_v3, %v531_v54 }
 0x378   :  { %1231 = vrcp.f32 %v315_v4 }
 0x379   :  { %543 = vrot.lane.b32.xlu1 %v539_v5, %s1444_s1 }
 0x37e   :  { %v1232_v7 = vpop.eup %1231 }
 0x37f   :  { %v348_v8 = vmul.f32 %v1232_v7, %v1650_v17 }
 0x381   :  { %350 = vst.msk [vmem:[#allocation4 + $0x8] sm:$0xff] %vm265_vm1, %v348_v8 }
 0x382   :  { %989 = vadd.xlane.f32.xlu0 %v988_v9 }
 0x38a   :  { %699 = vadd.xlane.f32.xlu0 %v698_v10 }
 0x38c   :  { %v403_v12 = vpop.xlane.xlu0 %402 }
 0x38d   :  { %1233 = vrcp.f32 %v403_v12  ;;  %v1190_v12 = vld [vmem:[%s1807_s9] ss:$0 sm:$0xff] }
 0x393   :  { %v1234_v60 = vpop.eup %1233 }
 0x394   :  { %v440_v17 = vmul.f32 %v1234_v60, %v1669_v33 }
 0x3a3   :  { %790 = vadd.xlane.f32.xlu1 %v789_v11 }
 0x3b1   :  { %v888_v13 = vpop.xlane.xlu1 %887 }
 0x3b5   :  { %v631_v6 = vpop.f32.mrf.mxu2 }
 0x3b9   :  { %v601_v14 = vpop.xlane.xlu1 %600  ;;  %v891_v30 = vpop.xlane.xlu2 %890 }
 0x3ba   :  { %1235 = vrcp.f32 %v601_v14 }
 0x3bb   :  { %1237 = vrcp.f32 %v888_v13 }
 0x3bc   :  { %445 = vrot.lane.b32.xlu1 %v440_v17, %s1435_s22 }
 0x3bd   :  { %v634_v22 = vpop.f32.mrf.mxu2 }
 0x3c0   :  { %v1236_v16 = vpop.eup %1235 }
 0x3c1   :  { %v639_v18 = vmul.f32 %v1236_v16, %v631_v6  ;;  %v604_v20 = vpop.xlane.xlu1 %603  ;;  %v1238_v15 = vpop.eup %1237 }
 0x3c2   :  { %1239 = vrcp.f32 %v604_v20 }
 0x3c3   :  { %643 = vrot.lane.b32.xlu2 %v639_v18, %s1445_s4 }
 0x3c5   :  { %v819_v28 = vpop.f32.mrf.mxu2 }
 0x3c6   :  { %v987_v37 = vpop.xlane.xlu2 %986 }
 0x3c8   :  { %v1240_v24 = vpop.eup %1239 }
 0x3c9   :  { %v788_v23 = vpop.xlane.xlu1 %787  ;;  %v640_v25 = vmul.f32 %v1240_v24, %v634_v22 }
 0x3ca   :  { %v444_v59 = vpop.permute.xlu0 %443  ;;  %1241 = vrcp.f32 %v788_v23 }
 0x3cb   :  { %450 = vst.msk [vmem:[#allocation4] sm:$0xff] %vm449_vm2, %v444_v59  ;;  %1243 = vrcp.f32 %v891_v30 }
 0x3cc   :  { %1245 = vrcp.f32 %v987_v37 }
 0x3ce   :  { %v546_v52 = vpop.permute.xlu2 %545 }
 0x3d0   :  { %v1242_v29 = vpop.eup %1241  ;;  %v822_v34 = vpop.f32.mrf.mxu2 }
 0x3d1   :  { %v827_v31 = vmul.f32 %v1242_v29, %v819_v28  ;;  %v1244_v38 = vpop.eup %1243 }
 0x3d2   :  { %v1246_v42 = vpop.eup %1245 }
 0x3d8   :  { %v1017_v40 = vpop.f32.mrf.mxu2 }
 0x3d9   :  { %v1025_v45 = vmul.f32 %v1246_v42, %v1017_v40 }
 0x3e0   :  { %v918_v33 = vpop.f32.mrf.mxu0  ;;  %v1020_v50 = vpop.f32.mrf.mxu2 }
 0x3e1   :  { %v926_v21 = vmul.f32 %v1238_v15, %v918_v33 }
 0x3e3   :  { %930 = vrot.lane.b32.xlu1 %v926_v21, %s1444_s1 }
 0x3e8   :  { %v921_v36 = vpop.f32.mrf.mxu0 }
 0x3e9   :  { %v927_v39 = vmul.f32 %v1244_v38, %v921_v36 }
 0x3eb   :  { %645 = vrot.lane.b32.xlu1 %v640_v25, %s1445_s4  ;;  %v544_v26 = vpop.permute.xlu1 %543 }
 0x3ec   :  { %550 = vst.msk [vmem:[#allocation4] sm:$0xff] %vm549_vm3, %v544_v26  ;;  %702 = vadd.xlane.f32.xlu2 %v701_v27 }
 0x3f3   :  { %831 = vrot.lane.b32.xlu1 %v827_v31, %s1435_s22 }
 0x3f5   :  { %v990_v35 = vpop.xlane.xlu0 %989 }
 0x3fb   :  { %932 = vrot.lane.b32.xlu1 %v927_v39, %s1444_s1 }
 0x3fd   :  { %v700_v0 = vpop.xlane.xlu0 %699 }
 0x3fe   :  { %1247 = vrcp.f32 %v700_v0 }
 0x3ff   :  { %1249 = vrcp.f32 %v990_v35 }
 0x403   :  { %1029 = vrot.lane.b32.xlu1 %v1025_v45, %s1445_s4 }
 0x404   :  { %v1248_v47 = vpop.eup %1247 }
 0x405   :  { %v735_v48 = vmul.f32 %v1248_v47, %v727_v19  ;;  %v1250_v49 = vpop.eup %1249 }
 0x406   :  { %v1026_v51 = vmul.f32 %v1250_v49, %v1020_v50 }
 0x407   :  { %737 = vst.msk [vmem:[#allocation4 + $0x10] sm:$0xff] %vm265_vm1, %v735_v48 }
 0x40b   :  { %1031 = vrot.lane.b32.xlu1 %v1026_v51, %s1445_s4 }
 0x416   :  { %v791_v53 = vpop.xlane.xlu1 %790 }
 0x417   :  { %1251 = vrcp.f32 %v791_v53 }
 0x41d   :  { %v1252_v54 = vpop.eup %1251  ;;  %v644_v55 = vpop.permute.xlu2 %643 }
 0x41e   :  { %650 = vst.msk [vmem:[#allocation4] sm:$0xff] %vm649_vm4, %v644_v55  ;;  %v828_v56 = vmul.f32 %v1252_v54, %v822_v34 }
 0x420   :  { %833 = vrot.lane.b32.xlu0 %v828_v56, %s1435_s22 }
 0x425   :  { %v1042_v57 = vld [vmem:[#allocation4] sm:$0xff] }
 0x426   :  { %1164 = vmatmul.msk.f32.vlgmr.msra.gmra.mxu3 %vm149_vm0, %v1042_v57 }
 0x42e   :  { %v446_v58 = vpop.permute.xlu1 %445 }
 0x42f   :  { %451 = vst.msk [vmem:[#allocation4 + $0x8] sm:$0xff] %vm449_vm2, %v446_v58 }
 0x430   :  { %551 = vst.msk [vmem:[#allocation4 + $0x8] sm:$0xff] %vm549_vm3, %v546_v52 }
 0x455   :  { %v931_v61 = vpop.permute.xlu1 %930 }
 0x45d   :  { %v646_v62 = vpop.permute.xlu1 %645 }
 0x45e   :  { %651 = vst.msk [vmem:[#allocation4 + $0x8] sm:$0xff] %vm649_vm4, %v646_v62 }
 0x45f   :  { %v703_v63 = vpop.xlane.xlu2 %702 }
 0x460   :  { %1253 = vrcp.f32 %v703_v63 }
 0x465   :  { %v832_v32 = vpop.permute.xlu1 %831  ;;  %v1043_v2 = vld [vmem:[#allocation4 + $0x8] sm:$0xff] }
 0x466   :  { %v1254_v3 = vpop.eup %1253  ;;  %837 = vst.msk [vmem:[#allocation4 + $0x10] sm:$0xff] %vm449_vm2, %v832_v32  ;;  %1165 = vmatmul.msk.f32.gmra.mxu3 %vm149_vm0, %v1043_v2 }
 0x467   :  { %v736_v4 = vmul.f32 %v1254_v3, %v1756_v1  ;;  %936 = vst.msk [vmem:[#allocation4 + $0x10] sm:$0xff] %vm549_vm3, %v931_v61 }
 0x469   :  { %738 = vst.msk [vmem:[#allocation4 + $0x18] sm:$0xff] %vm265_vm1, %v736_v4 }
 0x46d   :  { %v933_v5 = vpop.permute.xlu1 %932 }
 0x475   :  { %v1030_v7 = vpop.permute.xlu1 %1029 }
 0x476   :  { %1035 = vst.msk [vmem:[#allocation4 + $0x10] sm:$0xff] %vm649_vm4, %v1030_v7 }
 0x47d   :  { %v1044_v8 = vld [vmem:[#allocation4 + $0x10] sm:$0xff]  ;;  %v1032_v10 = vpop.permute.xlu1 %1031 }
 0x47e   :  { %1166 = vmatmul.msk.f32.gmra.mxu3 %vm149_vm0, %v1044_v8 }
 0x492   :  { %v834_v9 = vpop.permute.xlu0 %833 }
 0x493   :  { %838 = vst.msk [vmem:[#allocation4 + $0x18] sm:$0xff] %vm449_vm2, %v834_v9 }
 0x494   :  { %937 = vst.msk [vmem:[#allocation4 + $0x18] sm:$0xff] %vm549_vm3, %v933_v5 }
 0x495   :  { %1036 = vst.msk [vmem:[#allocation4 + $0x18] sm:$0xff] %vm649_vm4, %v1032_v10 }
 0x49c   :  { %v1045_v11 = vld [vmem:[#allocation4 + $0x18] sm:$0xff] }
 0x49d   :  { %1167 = vmatmul.msk.f32.gmra.mxu3 %vm149_vm0, %v1045_v11 }
 0x4a9   :  { %v1078_v13 = vpop.f32.mrf.mxu3 }
 0x4aa   :  { %v1079_v60 = vadd.f32 %v1190_v12, %v1078_v13 }
 0x4ac   :  { %1090 = vst.msk [vmem:[#allocation16] sm:$0xff] %vm149_vm0, %v1079_v60 }
 0x4e9   :  { %v1081_v14 = vpop.f32.mrf.mxu3 }
 0x4ea   :  { %v1082_v17 = vadd.f32 %v1190_v12, %v1081_v14 }
 0x4ec   :  { %1091 = vst.msk [vmem:[#allocation16 + $0x8] sm:$0xff] %vm149_vm0, %v1082_v17 }
 0x501   :  { %v1084_v16 = vpop.f32.mrf.mxu3 }
 0x502   :  { %v1085_v6 = vadd.f32 %v1190_v12, %v1084_v16 }
 0x504   :  { %1092 = vst.msk [vmem:[#allocation16 + $0x10] sm:$0xff] %vm149_vm0, %v1085_v6 }
 0x520   :  { %v1087_v18 = vpop.f32.mrf.mxu3 }
 0x521   :  { %v1088_v59 = vadd.f32 %v1190_v12, %v1087_v18 }
 0x523   :  { %1093 = vst.msk [vmem:[#allocation16 + $0x18] sm:$0xff] %vm149_vm0, %v1088_v59 }
 0x524   :  { %1106 = dma.vmem_to_hbm [thread:$0]  %s1099_s30, 512, %s1101_s12, [#allocation7], %s1434_s21, %s1434_s21, %s1435_s22  }
 0x525   :  { %1431 = dma.done.wait [#allocation7], 512  }
 0x526   :  { %1432 = vsyncadd [#allocation7], 4294966784 }
 0x527   :  { %1111 = vsyncpa [#allocation6], 1 }
 0x528   :  { %1112 = vsyncpa [#allocation9], 1 }
 0x529   :  { %1113 = vsyncpa [#allocation12], 1 }
 0x52a   :  { %1114 = vsyncpa [#allocation15], 1 }
 0x52b   :  { %1115 = vsyncpa [#allocation7], 1 }

</bundles_post_ra>
